<compile_context>
chip_gen: v7x
topology: tpu7x:2x2x1
jax: 0.10.0
libtpu: 0.0.40
codegen_flags: <defaults>
</compile_context>

<pallas_src>
import jax
import jax.numpy as jnp
from jax.experimental import pallas as pl
from jax.experimental.pallas import tpu as pltpu


# ---------------------------------------------------------------------------
# Kernel
# ---------------------------------------------------------------------------
def _mlp_embed_kernel(x_ref, w1_ref, b1_ref, w2_ref, b2_ref, o_ref):
    """One batch tile: relu(x @ w1 + b1) @ w2 + b2, then row-wise L2 normalize."""
    x = x_ref[...]                            # (TB, dim_in) native dtype -> MXU
    w1 = w1_ref[...]                          # (dim_in, hidden)
    w2 = w2_ref[...]                          # (hidden, dim_out)
    b1 = b1_ref[...]                          # (1, hidden)  f32 (pre-cast)
    b2 = b2_ref[...]                          # (1, dim_out) f32 (pre-cast)

    # linear1 + ReLU: MXU matmul, f32 accumulation, f32 epilogue on the VPU.
    h = jnp.dot(x, w1, preferred_element_type=jnp.float32) + b1
    h = jnp.maximum(h, 0.0)

    # linear2: feed activations back in the weight dtype (no-op for f32).
    y = jnp.dot(h.astype(w2.dtype), w2, preferred_element_type=jnp.float32) + b2

    # L2 normalization over features — matches the PyTorch Normalize(power=2)
    # exactly (no eps): norm = sqrt(sum(y^2)); out = y / norm.
    # rsqrt runs on the EUP, which has its own VLIW slot.
    ss = jnp.sum(y * y, axis=1, keepdims=True)
    o_ref[...] = (y * jax.lax.rsqrt(ss)).astype(o_ref.dtype)


# ---------------------------------------------------------------------------
# Parameter preparation (one-time, outside the hot path)
# ---------------------------------------------------------------------------
def prepare_params(w1, b1, w2, b2):
    """torch nn.Linear layout (fan_out, fan_in) -> kernel layout:
    pre-transposed weights and f32 (1, N) biases (no per-call transpose/cast)."""
    return (jnp.transpose(w1),
            b1.reshape(1, -1).astype(jnp.float32),
            jnp.transpose(w2),
            b2.reshape(1, -1).astype(jnp.float32))


# ---------------------------------------------------------------------------
# Tiling / VMEM accounting
# ---------------------------------------------------------------------------
def _round_up(n, m):
    return ((n + m - 1) // m) * m


def _vmem_limit_bytes():
    """Explicit per-generation VMEM limit with ~25% headroom for compiler scratch."""
    try:
        cap = int(pltpu.get_tpu_info().vmem_capacity_bytes)
    except Exception:
        cap = 64 * 1024 * 1024          # conservative (v7x physical) fallback
    return int(cap * 0.75)


def _choose_batch_tile(B, dim_in, hidden, dim_out,
                       x_itemsize, out_itemsize, budget_bytes):
    """Largest 8-aligned batch tile whose *lane-padded* footprint fits the budget.

    Accounts for: double-buffered x and out tiles, f32 intermediates (h, y),
    and the resident (conservatively double-buffered) weights/biases."""
    if B <= 8:
        return B

    # Lane-padded bytes per batch row.
    x_row = _round_up(dim_in, 128) * x_itemsize
    o_row = _round_up(dim_out, 128) * out_itemsize
    i_row = (_round_up(hidden, 128) + _round_up(dim_out, 128)) * 4   # f32 h, y
    per_row = 2 * (x_row + o_row) + i_row                            # x/out x2 (double-buffered)

    # Resident weights + biases (padded, assume pipeline double-buffers them too).
    w_bytes = 2 * 4 * (_round_up(dim_in, 8) * _round_up(hidden, 128)
                       + _round_up(hidden, 8) * _round_up(dim_out, 128)
                       + 8 * _round_up(hidden, 128)
                       + 8 * _round_up(dim_out, 128))

    avail = budget_bytes - w_bytes
    if avail <= per_row * 8:
        tb = 8                                   # weights dominate: minimal stream tile
    else:
        tb = max(8, ((avail // per_row) // 8) * 8)

    # At least 2 grid steps so both v7x TensorCores get work (cheap on v5e/v6e).
    half = _round_up((B + 1) // 2, 8)
    tb = min(tb, half, _round_up(B, 8))
    return tb


# ---------------------------------------------------------------------------
# Wrapper
# ---------------------------------------------------------------------------
def frame_mlp_embed(x, w1_t, b1_2d, w2_t, b2_2d):
    """x: (B, dim_in); w1_t: (dim_in, hidden); b1_2d: (1, hidden);
    w2_t: (hidden, dim_out); b2_2d: (1, dim_out).  Returns (B, dim_out)."""
    B, dim_in = x.shape
    hidden = w1_t.shape[1]
    dim_out = w2_t.shape[1]

    vmem_limit = _vmem_limit_bytes()
    tb = _choose_batch_tile(
        B, dim_in, hidden, dim_out,
        jnp.dtype(x.dtype).itemsize, jnp.dtype(x.dtype).itemsize,
        budget_bytes=int(vmem_limit * 0.8))
    grid = (pl.cdiv(B, tb),)

    out_itemsize = jnp.dtype(x.dtype).itemsize
    cost = pl.CostEstimate(
        flops=int(2 * B * (dim_in * hidden + hidden * dim_out)),
        transcendentals=int(B),
        bytes_accessed=int(x.size * x.dtype.itemsize
                           + B * dim_out * out_itemsize
                           + w1_t.size * w1_t.dtype.itemsize
                           + w2_t.size * w2_t.dtype.itemsize
                           + b1_2d.size * 4 + b2_2d.size * 4),
    )

    # x / out are batch-tiled (auto double-buffered); weights/biases use
    # constant index_maps so they are DMA'd once and stay resident in VMEM.
    return pl.pallas_call(
        _mlp_embed_kernel,
        out_shape=jax.ShapeDtypeStruct((B, dim_out), x.dtype),
        grid=grid,
        in_specs=[
            pl.BlockSpec((tb, dim_in), lambda i: (i, 0)),
            pl.BlockSpec((dim_in, hidden), lambda i: (0, 0)),
            pl.BlockSpec((1, hidden), lambda i: (0, 0)),
            pl.BlockSpec((hidden, dim_out), lambda i: (0, 0)),
            pl.BlockSpec((1, dim_out), lambda i: (0, 0)),
        ],
        out_specs=pl.BlockSpec((tb, dim_out), lambda i: (i, 0)),
        compiler_params=pltpu.CompilerParams(
            dimension_semantics=("parallel",),
            vmem_limit_bytes=vmem_limit,
        ),
        cost_estimate=cost,
    )(x, w1_t, b1_2d, w2_t, b2_2d)


# ---------------------------------------------------------------------------
# Demo / correctness check
# ---------------------------------------------------------------------------
def _torch_linear_init(key, fan_out, fan_in):
    """Deterministic init mimicking nn.Linear defaults: U(-1/sqrt(fan_in), +)."""
    kw, kb = jax.random.split(key)
    bound = 1.0 / jnp.sqrt(jnp.float32(fan_in))
    w = jax.random.uniform(kw, (fan_out, fan_in), jnp.float32, -bound, bound)
    b = jax.random.uniform(kb, (fan_out,), jnp.float32, -bound, bound)
    return w, b


if __name__ == "__main__":
    # Module defaults: dim_in=1024, dim_out=128, hidden=2*dim_out=256 — these
    # are 128-lane aligned, so x loads and out stores are lane-dense.
    B, dim_in, dim_out = 256, 1024, 128
    hidden = 2 * dim_out

    key = jax.random.PRNGKey(0)
    kx, k1, k2 = jax.random.split(key, 3)

    x = jax.random.normal(kx, (B, dim_in), jnp.float32)
    w1, b1 = _torch_linear_init(k1, hidden, dim_in)     # linear1: (2*dim_out, dim_in)
    w2, b2 = _torch_linear_init(k2, dim_out, hidden)    # linear2: (dim_out, 2*dim_out)

    # One-time parameter prep (transpose + bias reshape/cast) outside the hot path.
    params = prepare_params(w1, b1, w2, b2)

    out = frame_mlp_embed(x, *params)
    out = jax.block_until_ready(out)

    # Reference in plain JAX (same math as the PyTorch module, no eps).
    h_ref = jnp.maximum(x @ w1.T + b1, 0.0)
    y_ref = h_ref @ w2.T + b2
    ref = y_ref / jnp.sqrt(jnp.sum(y_ref ** 2, axis=1, keepdims=True))
    assert out.shape == (B, dim_out)
    assert jnp.allclose(out, ref, atol=1e-4, rtol=1e-4), "mismatch vs reference"

    print("KERNEL_OK")
</pallas_src>

<mosaic_0001>
module attributes {stable_mosaic.version = 11 : i64} {
  func.func @_mlp_embed_kernel(%arg0: i32, %arg1: memref<128x1024xf32, #tpu.memory_space<vmem>>, %arg2: memref<1024x256xf32, #tpu.memory_space<vmem>>, %arg3: memref<1x256xf32, #tpu.memory_space<vmem>>, %arg4: memref<256x128xf32, #tpu.memory_space<vmem>>, %arg5: memref<1x128xf32, #tpu.memory_space<vmem>>, %arg6: memref<128x128xf32, #tpu.memory_space<vmem>>) attributes {dimension_semantics = [#tpu.dimension_semantics<parallel>], iteration_bounds = array<i64: 2>, scalar_prefetch = 0 : i64, scratch_operands = 0 : i64, tpu.core_type = #tpu.core_type<tc>, window_params = [{transform_indices = @transform_0, window_bounds = array<i64: 128, 1024>}, {pipeline_mode = #tpu.pipeline_mode<synchronous>, transform_indices = @transform_1, window_bounds = array<i64: 1024, 256>}, {pipeline_mode = #tpu.pipeline_mode<synchronous>, transform_indices = @transform_2, window_bounds = array<i64: 1, 256>}, {pipeline_mode = #tpu.pipeline_mode<synchronous>, transform_indices = @transform_3, window_bounds = array<i64: 256, 128>}, {pipeline_mode = #tpu.pipeline_mode<synchronous>, transform_indices = @transform_4, window_bounds = array<i64: 1, 128>}, {transform_indices = @transform_5, window_bounds = array<i64: 128, 128>}]} {
    %c0 = arith.constant 0 : index
    %c0_0 = arith.constant 0 : index
    %0 = vector.load %arg1[%c0, %c0_0] : memref<128x1024xf32, #tpu.memory_space<vmem>>, vector<128x1024xf32>
    %c0_1 = arith.constant 0 : index
    %c0_2 = arith.constant 0 : index
    %1 = vector.load %arg2[%c0_1, %c0_2] : memref<1024x256xf32, #tpu.memory_space<vmem>>, vector<1024x256xf32>
    %c0_3 = arith.constant 0 : index
    %c0_4 = arith.constant 0 : index
    %2 = vector.load %arg4[%c0_3, %c0_4] : memref<256x128xf32, #tpu.memory_space<vmem>>, vector<256x128xf32>
    %c0_5 = arith.constant 0 : index
    %c0_6 = arith.constant 0 : index
    %3 = vector.load %arg3[%c0_5, %c0_6] : memref<1x256xf32, #tpu.memory_space<vmem>>, vector<1x256xf32>
    %c0_7 = arith.constant 0 : index
    %c0_8 = arith.constant 0 : index
    %4 = vector.load %arg5[%c0_7, %c0_8] : memref<1x128xf32, #tpu.memory_space<vmem>>, vector<1x128xf32>
    %cst = arith.constant dense<0.000000e+00> : vector<128x256xf32>
    %5 = tpu.matmul %0, %1, %cst {dimension_numbers = #tpu.dot_dimension_numbers<[1], [0], [0], [1], [0, 0, 1, 1], [], []>} : vector<128x1024xf32>, vector<1024x256xf32>, vector<128x256xf32> -> vector<128x256xf32>
    %6 = vector.broadcast %3 : vector<1x256xf32> to vector<128x256xf32>
    %7 = arith.addf %5, %6 : vector<128x256xf32>
    %cst_9 = arith.constant 0.000000e+00 : f32
    %8 = vector.broadcast %cst_9 : f32 to vector<128x256xf32>
    %9 = arith.maximumf %7, %8 : vector<128x256xf32>
    %cst_10 = arith.constant dense<0.000000e+00> : vector<128x128xf32>
    %10 = tpu.matmul %9, %2, %cst_10 {dimension_numbers = #tpu.dot_dimension_numbers<[1], [0], [0], [1], [0, 0, 1, 1], [], []>} : vector<128x256xf32>, vector<256x128xf32>, vector<128x128xf32> -> vector<128x128xf32>
    %11 = vector.broadcast %4 : vector<1x128xf32> to vector<128x128xf32>
    %12 = arith.addf %10, %11 : vector<128x128xf32>
    %13 = arith.mulf %12, %12 : vector<128x128xf32>
    %cst_11 = arith.constant dense<0.000000e+00> : vector<128xf32>
    %14 = vector.multi_reduction <add>, %13, %cst_11 [1] : vector<128x128xf32> to vector<128xf32>
    %15 = vector.shape_cast %14 : vector<128xf32> to vector<128x1xf32>
    %16 = math.rsqrt %15 : vector<128x1xf32>
    %17 = vector.broadcast %16 : vector<128x1xf32> to vector<128x128xf32>
    %18 = arith.mulf %12, %17 : vector<128x128xf32>
    %c0_12 = arith.constant 0 : index
    %c0_13 = arith.constant 0 : index
    %19 = vector.load %arg6[%c0_12, %c0_13] : memref<128x128xf32, #tpu.memory_space<vmem>>, vector<128x128xf32>
    tpu.vector_store %arg6[%c0_12, %c0_13], %18 {strides = array<i32>} : memref<128x128xf32, #tpu.memory_space<vmem>>, vector<128x128xf32>,
    return
  }
  func.func @transform_0(%arg0: i32) -> (i32, i32) {
    %c0_i32 = arith.constant 0 : i32
    %c0_i32_0 = arith.constant 0 : i32
    return %arg0, %c0_i32 : i32, i32
  }
  func.func @transform_1(%arg0: i32) -> (i32, i32) {
    %c0_i32 = arith.constant 0 : i32
    %c0_i32_0 = arith.constant 0 : i32
    %c0_i32_1 = arith.constant 0 : i32
    return %c0_i32, %c0_i32_0 : i32, i32
  }
  func.func @transform_2(%arg0: i32) -> (i32, i32) {
    %c0_i32 = arith.constant 0 : i32
    %c0_i32_0 = arith.constant 0 : i32
    %c0_i32_1 = arith.constant 0 : i32
    return %c0_i32, %c0_i32_0 : i32, i32
  }
  func.func @transform_3(%arg0: i32) -> (i32, i32) {
    %c0_i32 = arith.constant 0 : i32
    %c0_i32_0 = arith.constant 0 : i32
    %c0_i32_1 = arith.constant 0 : i32
    return %c0_i32, %c0_i32_0 : i32, i32
  }
  func.func @transform_4(%arg0: i32) -> (i32, i32) {
    %c0_i32 = arith.constant 0 : i32
    %c0_i32_0 = arith.constant 0 : i32
    %c0_i32_1 = arith.constant 0 : i32
    return %c0_i32, %c0_i32_0 : i32, i32
  }
  func.func @transform_5(%arg0: i32) -> (i32, i32) {
    %c0_i32 = arith.constant 0 : i32
    %c0_i32_0 = arith.constant 0 : i32
    return %arg0, %c0_i32 : i32, i32
  }
}

</mosaic_0001>

<bundles_post_ra>
// kernel: tpu_custom_call.1
= control target key start
LH: loop header
LB: loop body
LE: loop exit
PB: predicated region body
PF: predicated region fallthrough
CT: control target
= control target key end

     0   :  { %10 = vsyncpa [#allocation3], 0  ;;  %s3357_s0 = inlined_call_operand.hbm [shape: f32[256,1024], index: 0, kind: input, shape index: {}]   ;;  %s3358_s1 = inlined_call_operand.hbm [shape: f32[1024,256], index: 1, kind: input, shape index: {}]   ;;  %s3359_s2 = inlined_call_operand.vmem [shape: f32[1,256], index: 2, kind: input, shape index: {}]   ;;  %s3360_s3 = inlined_call_operand.hbm [shape: f32[256,128], index: 3, kind: input, shape index: {}]   ;;  %s3361_s4 = inlined_call_operand.vmem [shape: f32[1,128], index: 4, kind: input, shape index: {}]   ;;  %s3362_s5 = inlined_call_operand.hbm [shape: f32[256,128], index: 5, kind: output, shape index: {}]  }
   0x1   :  { %12 = vsyncpa [#allocation3 + $0x1], 0 }
   0x2   :  { %13 = vsyncpa [#allocation6], 0 }
   0x3   :  { %14 = vsyncpa [#allocation4], 0 }
   0x4   :  { %16 = vsyncpa [#allocation4 + $0x1], 0  ;;  %s2591_s18 = smov 0   ;;  %s2593_s19 = smov 0  }
   0x5   :  { %s2595_s20 = smov 0   ;;  %s2597_s21 = smov 0  }
   0x6 LB: > { %s2612_s22 = sadd.s32 4294967295, %s2547_s21   ;;  %s1733_s23 = sadd.s32 4294967294, %s2547_s21   ;;  %s2547_s21 = sphi %s2597_s21, %s3382_s21   ;;  %s2543_s20 = sphi %s2595_s20, %s3381_s20   ;;  %s2539_s19 = sphi %s2593_s19, %s3380_s19   ;;  %s2535_s18 = sphi %s2591_s18, %s3379_s18  }
   0x7   : > { %p42_p0 = scmp.ne.s32.totalorder %s2539_s19, %s2535_s18  ;;  %p3363_p1 = scmp.eq.s32.totalorder %s2612_s22, 0 }
   0x8   : > { %p156_p3 = scmp.eq.s32.totalorder %s1733_s23, 1  ;;  %p1734_p5 = scmp.ge.s32.totalorder %s2547_s21, 1 }
   0x9   : > { %p2621_p4 = por %p3363_p1, %p42_p0  ;;  %p163_p7 = scmp.lt.s32.totalorder %s2547_s21, 3 }
   0xa   : > { %p2626_p6 = por %p156_p3, %p42_p0  ;;  %s2549_s27 = smov [#allocation5]  }
   0xb   : > { %s3366_s24 = scalar_select %p2621_p4, 1, 0 }
   0xc   : > { %s3367_s25 = scalar_select %p2626_p6, 1, 0 }
   0xd   : > { %p2631_p8 = pnand %p1734_p5, %p163_p7  ;;  %s175_s28 = sshll.u32 %s2549_s27, 4  ;;  %s2635_s28 = int_to_ptr.vmem [resolvable:$true] %s175_s28 }
   0xe   : > { %s2550_s30 = smov [#allocation7]   ;;  %s2391_s9 = scalar_lea.hbm %s3358_s1, 32768 }
   0xf   : > { %p2296_p9 = pneg %p2631_p8  ;;  %s191_s6 = sshll.u32 %s2550_s30, 4  ;;  %s2646_s6 = int_to_ptr.vmem [resolvable:$true] %s191_s6 }
  0x10   : > { %p2392_p12 = scmp.ne.s32.totalorder %s3358_s1, %s2391_s9  ;;  %p2398_p5 = scmp.lt.u32.totalorder %s2391_s9, %s3358_s1 }
  0x11   : > { %p2642_p11 = pnand %p2296_p9, %p3363_p1 }
  0x13   : > { %p2393_p13 = pneg %p2642_p11 }
  0x15   : > { %p2394_p0 = pnand %p2393_p13, %p2392_p12 }
  0x17   : > { %p2395_p3 = pneg %p2394_p0 }
  0x19   : > { %p2400_p7 = pnand %p2398_p5, %p2395_p3 }
  0x1b   : > { %2403 = shalt.err (!%p2400_p7)
}
  0x1c   : > { %s2404_s14 = scalar_lea.vmem %s2635_s28, 32768  ;;  %p2412_p2 = scmp.lt.s32.totalorder %s2635_s28, %s2635_s28 }
  0x1d   : > { %p2405_p9 = scmp.ne.s32.totalorder %s2635_s28, %s2404_s14  ;;  %p2413_p12 = scmp.lt.s32.totalorder %s2404_s14, %s2404_s14 }
  0x1f   : > { %p2407_p10 = pnand %p2405_p9, %p2393_p13  ;;  %p2414_p0 = por %p2413_p12, %p2412_p2 }
  0x21   : > { %p2408_p1 = pneg %p2407_p10 }
  0x23   : > { %p2415_p6 = pnand %p2414_p0, %p2408_p1 }
  0x25   : > { %2418 = shalt.err (!%p2415_p6)
}
  0x26   : > { %s2551_s15 = smov 256   ;;  %s2552_s16 = smov 16  }
  0x27   : > { %2299 = dma.hbm_to_vmem [thread:$0]  (!%p2642_p11), %s3358_s1, 32768, %s2635_s28, [#allocation6], %s2551_s15, %s2551_s15, %s2552_s16  }
  0x28   : > { %s2419_s7 = scalar_lea.hbm %s3360_s3, 4096 }
  0x29   : > { %p2420_p2 = scmp.ne.s32.totalorder %s3360_s3, %s2419_s7  ;;  %p2426_p10 = scmp.lt.u32.totalorder %s2419_s7, %s3360_s3 }
  0x2b   : > { %p2422_p1 = pnand %p2420_p2, %p2393_p13 }
  0x2d   : > { %p2423_p6 = pneg %p2422_p1 }
  0x2f   : > { %p2428_p3 = pnand %p2426_p10, %p2423_p6 }
  0x31   : > { %2431 = shalt.err (!%p2428_p3)
}
  0x32   : > { %s2432_s28 = scalar_lea.vmem %s2646_s6, 4096  ;;  %p2440_p12 = scmp.lt.s32.totalorder %s2646_s6, %s2646_s6 }
  0x33   : > { %p2433_p5 = scmp.ne.s32.totalorder %s2646_s6, %s2432_s28  ;;  %p2441_p0 = scmp.lt.s32.totalorder %s2432_s28, %s2432_s28 }
  0x35   : > { %p2435_p7 = pnand %p2433_p5, %p2393_p13  ;;  %p2442_p2 = por %p2441_p0, %p2440_p12 }
  0x37   : > { %p2436_p9 = pneg %p2435_p7 }
  0x39   : > { %p2443_p1 = pnand %p2442_p2, %p2436_p9 }
  0x3b   : > { %2446 = shalt.err (!%p2443_p1)
}
  0x3c   : > { %s2553_s12 = smov 128   ;;  %s2554_s13 = smov 8  }
  0x3d   : > { %2302 = dma.hbm_to_vmem [thread:$0]  (!%p2642_p11), %s3360_s3, 4096, %s2646_s6, [#allocation6], %s2553_s12, %s2553_s12, %s2554_s13  }
  0x3e   : > { %s2701_s16 = sadd.s32 1, %s2547_s21   ;;  %s29_s23 = sadd.s32 1, %s2543_s20 }
  0x3f   : > { %s26_s17 = ssub.s32 %s2547_s21, %s2701_s16  ;;  %p36_p6 = scmp.ne.s32.totalorder %s2543_s20, %s2539_s19 }
  0x40   : > { %p27_p13 = scmp.eq.s32.totalorder %s26_s17, 0  ;;  %p37_p10 = scmp.eq.s32.totalorder %s2547_s21, 0 }
  0x41   : > { %p3370_p5 = scmp.eq.s32.totalorder %s2612_s22, 1  ;;  %p2313_p9 = scmp.lt.s32.totalorder %s2547_s21, 2 }
  0x42   : > { %s2710_s27 = scalar_select %p27_p13, %s2543_s20, %s29_s23  }
  0x43   : > { %p38_p3 = por %p37_p10, %p36_p6  ;;  %p2714_p7 = por %p3370_p5, %p36_p6 }
  0x44   : > { %s208_s29 = sand.u32 1, %s2543_s20   ;;  %s1754_s6 = sshll.u32 %s2547_s21, 14 }
  0x45   : > { %s3371_s30 = scalar_select %p2714_p7, 1, 0 }
  0x46   : > { %s1738_s7 = sshll.u32 %s208_s29, 10  ;;  %s2724_s10 = scalar_lea.hbm %s3357_s0, %s1754_s6 }
  0x47   : > { %s212_s11 = scalar_lea.vmem [#allocation2], %s1738_s7  ;;  %p2728_p11 = pnand %p2313_p9, %p38_p3 }
  0x48   : > { %s220_s28 = sshll.u32 %s212_s11, 4  ;;  %s2732_s13 = scalar_lea.sflag [#allocation3], %s208_s29  ;;  %s2726_s28 = int_to_ptr.vmem [resolvable:$true] %s220_s28 }
  0x49   : > { %s2447_s14 = scalar_lea.hbm %s2724_s10, 16384  ;;  %p2449_p0 = pneg %p2728_p11 }
  0x4a   : > { %p2448_p12 = scmp.ne.s32.totalorder %s2724_s10, %s2447_s14  ;;  %s2452_s23 = scalar_lea.hbm %s3357_s0, 32768 }
  0x4b   : > { %p2453_p13 = scmp.lt.u32.totalorder %s2724_s10, %s3357_s0  ;;  %p2454_p6 = scmp.lt.u32.totalorder %s2452_s23, %s2447_s14 }
  0x4c   : > { %p2450_p2 = pnand %p2449_p0, %p2448_p12  ;;  %p2456_p3 = scmp.lt.u32.totalorder %s2447_s14, %s2724_s10 }
  0x4d   : > { %p2455_p10 = por %p2454_p6, %p2453_p13 }
  0x4e   : > { %p2451_p1 = pneg %p2450_p2 }
  0x4f   : > { %p2457_p5 = por %p2456_p3, %p2455_p10 }
  0x51   : > { %p2458_p9 = pnand %p2457_p5, %p2451_p1 }
  0x53   : > { %2461 = shalt.err (!%p2458_p9)
}
  0x54   : > { %s2462_s29 = scalar_lea.vmem %s2726_s28, 16384  ;;  %s2555_s8 = smov [#allocation2]  }
  0x55   : > { %p2463_p12 = scmp.ne.s32.totalorder %s2726_s28, %s2462_s29  ;;  %s2467_s9 = sshll.u32 %s2555_s8, 4  ;;  %s2468_s9 = int_to_ptr.vmem [resolvable:$false] %s2467_s9 }
  0x56   : > { %s2469_s11 = scalar_lea.vmem %s2468_s9, 32768  ;;  %p2470_p4 = scmp.lt.s32.totalorder %s2726_s28, %s2468_s9 }
  0x57   : > { %p2465_p2 = pnand %p2463_p12, %p2449_p0  ;;  %p2471_p13 = scmp.lt.s32.totalorder %s2469_s11, %s2462_s29 }
  0x59   : > { %p2466_p7 = pneg %p2465_p2  ;;  %p2472_p6 = por %p2471_p13, %p2470_p4 }
  0x5b   : > { %p2473_p10 = pnand %p2472_p6, %p2466_p7 }
  0x5d   : > { %2476 = shalt.err (!%p2473_p10)
}
  0x5e   : > { %s2556_s14 = smov 1024   ;;  %s2557_s15 = smov 64  }
  0x5f   : > { %2306 = dma.hbm_to_vmem [thread:$0]  (!%p2728_p11), %s2724_s10, 16384, %s2726_s28, %s2732_s13, %s2556_s14, %s2556_s14, %s2557_s15  }
  0x60   : > { %232 = sbr.rel (%p2631_p8) target bundleno = 969 (0x3c9), region = 40  ;;  %s2763_s17 = sand.u32 (!%p2631_p8), 1, %s2539_s19  }
  0x61   : > { %s1743_s23 = sshll.u32 (!%p2631_p8), %s2763_s17, 10  ;;  %s235_s7 = scalar_lea.sflag (!%p2631_p8), [#allocation3], %s2763_s17 }
  0x62   : > { %s2767_s6 = scalar_lea.vmem (!%p2631_p8), [#allocation2], %s1743_s23  ;;  %p3373_p4 = scmp.ne.s32.totalorder (!%p2631_p8), %s3366_s24, 0 }
  0x67   : > { %2522 = dma.done.wait (%p3373_p4), %s235_s7, 16384  }
  0x68   : > { %2524 = vsyncadd (%p3373_p4), %s235_s7, 4294950912  ;;  %p3374_p7 = scmp.eq.s32.totalorder %s2612_s22, 0 }
  0x6a   : > { %2526 = dma.done.wait (%p3374_p7), [#allocation6], 36864   ;;  %p3375_p8 = pmov %p3374_p7 }
  0x6b   : > { %v468_v0 = vld [vmem:[#allocation5 + $0x208] sm:$0xff]  ;;  %v470_v1 = vld [vmem:[#allocation5 + $0x218] sm:$0xff]  ;;  %v467_v2 = vld [vmem:[#allocation5 + $0x200] sm:$0xff]  ;;  %s1746_s12 = sshll.u32 %s2763_s17, 7  ;;  %s1755_s29 = sshll.u32 %s2612_s22, 11 }
  0x6c   : > { %2528 = vsyncadd (%p3375_p8), [#allocation6], 4294930432  ;;  %v1900_v3 = vpack.c.bf16 %v470_v1, %v468_v0  ;;  %v469_v4 = vld [vmem:[#allocation5 + $0x210] sm:$0xff]  ;;  %v472_v5 = vld [vmem:[#allocation5 + $0x228] sm:$0xff]  ;;  %s3273_s13 = scalar_lea.vmem [#allocation8], %s1746_s12  ;;  %s3309_s14 = scalar_lea.hbm %s3362_s5, %s1755_s29 }
  0x6d   : > { %v474_v6 = vld [vmem:[#allocation5 + $0x238] sm:$0xff]  ;;  %v1902_v7 = vpack.c.bf16 %v469_v4, %v467_v2  ;;  %v471_v9 = vld [vmem:[#allocation5 + $0x220] sm:$0xff]  ;;  %v473_v10 = vld [vmem:[#allocation5 + $0x230] sm:$0xff]  ;;  %s1641_s8 = sshll.u32 %s3273_s13, 4  ;;  %s1628_s15 = scalar_lea.sflag [#allocation4], %s2763_s17  ;;  %s3311_s8 = int_to_ptr.vmem [resolvable:$true] %s1641_s8 }
  0x6e   : > { %v1904_v8 = vpack.c.bf16 %v474_v6, %v472_v5  ;;  %v476_v11 = vld [vmem:[#allocation5 + $0x248] sm:$0xff]  ;;  %1901 = vmatprep.subr.bf16.mxu0 %v1900_v3  ;;  %v478_v12 = vld [vmem:[#allocation5 + $0x258] sm:$0xff]  ;;  %v1906_v13 = vpack.c.bf16 %v473_v10, %v471_v9  ;;  %v475_v15 = vld [vmem:[#allocation5 + $0x240] sm:$0xff]  ;;  %s2477_s23 = scalar_lea.vmem %s3311_s8, 2048  ;;  %p3376_p0 = scmp.ne.s32.totalorder %s3371_s30, 0 }
  0x6f   : > { %1903 = vmatpush1.bf16.msra.mxu0 %v1902_v7  ;;  %v1908_v14 = vpack.c.bf16 %v478_v12, %v476_v11  ;;  %v477_v16 = vld [vmem:[#allocation5 + $0x250] sm:$0xff]  ;;  %v480_v17 = vld [vmem:[#allocation5 + $0x268] sm:$0xff]  ;;  %v482_v18 = vld [vmem:[#allocation5 + $0x278] sm:$0xff]  ;;  %p2478_p11 = scmp.ne.s32.totalorder %s3311_s8, %s2477_s23  ;;  %s2558_s22 = smov [#allocation8]  }
  0x70   : > { %1905 = vmatprep.subr.bf16.mxu0 %v1904_v8  ;;  %v1910_v19 = vpack.c.bf16 %v477_v16, %v475_v15  ;;  %v1912_v20 = vpack.c.bf16 %v482_v18, %v480_v17  ;;  %v479_v21 = vld [vmem:[#allocation5 + $0x260] sm:$0xff]  ;;  %v481_v22 = vld [vmem:[#allocation5 + $0x270] sm:$0xff]  ;;  %v484_v23 = vld [vmem:[#allocation5 + $0x288] sm:$0xff]  ;;  %s2481_s7 = sshll.u32 %s2558_s22, 4  ;;  %s2482_s7 = int_to_ptr.vmem [resolvable:$false] %s2481_s7 }
  0x71   : > { %v486_v24 = vld [vmem:[#allocation5 + $0x298] sm:$0xff]  ;;  %v1914_v25 = vpack.c.bf16 %v481_v22, %v479_v21  ;;  %v404_v26 = vld [vmem:[#allocation5 + $0x8] sm:$0xff]  ;;  %v403_v28 = vld [vmem:[#allocation5] sm:$0xff]  ;;  %p2479_p1 = pnand %p2478_p11, %p3376_p0  ;;  %p2484_p5 = scmp.lt.s32.totalorder %s3311_s8, %s2482_s7 }
  0x72   : > { %v406_v27 = vld [vmem:[#allocation5 + $0x18] sm:$0xff]  ;;  %v1916_v29 = vpack.c.bf16 %v486_v24, %v484_v23  ;;  %v483_v30 = vld [vmem:[#allocation5 + $0x280] sm:$0xff]  ;;  %v485_v31 = vld [vmem:[#allocation5 + $0x290] sm:$0xff] }
  0x73   : > { %1907 = vmatpush1.bf16.msra.mxu0 %v1906_v13  ;;  %v1836_v32 = vpack.c.bf16 %v406_v27, %v404_v26  ;;  %v405_v33 = vld [vmem:[#allocation5 + $0x10] sm:$0xff]  ;;  %v488_v34 = vld [vmem:[#allocation5 + $0x2a8] sm:$0xff]  ;;  %v490_v35 = vld [vmem:[#allocation5 + $0x2b8] sm:$0xff]  ;;  %v1918_v41 = vpack.c.bf16 %v485_v31, %v483_v30  ;;  %p2480_p3 = pneg %p2479_p1 }
  0x74   : > { %1909 = vmatprep.subr.bf16.mxu0 %v1908_v14  ;;  %v1838_v36 = vpack.c.bf16 %v405_v33, %v403_v28  ;;  %v408_v37 = vld [vmem:[#allocation5 + $0x28] sm:$0xff]  ;;  %v410_v38 = vld [vmem:[#allocation5 + $0x38] sm:$0xff]  ;;  %v407_v39 = vld [vmem:[#allocation5 + $0x20] sm:$0xff]  ;;  %v1920_v46 = vpack.c.bf16 %v490_v35, %v488_v34 }
  0x75   : > { %1837 = vmatprep.subr.bf16.mxu1 %v1836_v32  ;;  %v409_v40 = vld [vmem:[#allocation5 + $0x30] sm:$0xff]  ;;  %v487_v42 = vld [vmem:[#allocation5 + $0x2a0] sm:$0xff]  ;;  %v1840_v44 = vpack.c.bf16 %v410_v38, %v408_v37  ;;  %v492_v47 = vld [vmem:[#allocation5 + $0x2c8] sm:$0xff] }
  0x76   : > { %v489_v43 = vld [vmem:[#allocation5 + $0x2b0] sm:$0xff]  ;;  %1839 = vmatpush1.bf16.msra.mxu1 %v1838_v36  ;;  %v1842_v45 = vpack.c.bf16 %v409_v40, %v407_v39  ;;  %v412_v48 = vld [vmem:[#allocation5 + $0x48] sm:$0xff]  ;;  %v414_v49 = vld [vmem:[#allocation5 + $0x58] sm:$0xff] }
  0x77   : > { %1911 = vmatpush1.bf16.msra.mxu0 %v1910_v19  ;;  %v494_v50 = vld [vmem:[#allocation5 + $0x2d8] sm:$0xff]  ;;  %1841 = vmatprep.subr.bf16.mxu1 %v1840_v44  ;;  %v1844_v51 = vpack.c.bf16 %v414_v49, %v412_v48  ;;  %v411_v52 = vld [vmem:[#allocation5 + $0x40] sm:$0xff]  ;;  %v413_v53 = vld [vmem:[#allocation5 + $0x50] sm:$0xff]  ;;  %v1922_v54 = vpack.c.bf16 %v489_v43, %v487_v42 }
  0x78   : > { %1913 = vmatprep.subr.bf16.mxu0 %v1912_v20  ;;  %v491_v55 = vld [vmem:[#allocation5 + $0x2c0] sm:$0xff]  ;;  %v1846_v56 = vpack.c.bf16 %v413_v53, %v411_v52  ;;  %v416_v57 = vld [vmem:[#allocation5 + $0x68] sm:$0xff]  ;;  %v418_v58 = vld [vmem:[#allocation5 + $0x78] sm:$0xff]  ;;  %v1924_v59 = vpack.c.bf16 %v494_v50, %v492_v47 }
  0x79   : > { %v493_v60 = vld [vmem:[#allocation5 + $0x2d0] sm:$0xff]  ;;  %v1848_v61 = vpack.c.bf16 %v418_v58, %v416_v57  ;;  %v415_v62 = vld [vmem:[#allocation5 + $0x60] sm:$0xff]  ;;  %v496_v0 = vld [vmem:[#allocation5 + $0x2e8] sm:$0xff] }
  0x7a   : > { %1843 = vmatpush1.bf16.msra.mxu1 %v1842_v45  ;;  %v417_v63 = vld [vmem:[#allocation5 + $0x70] sm:$0xff]  ;;  %v498_v1 = vld [vmem:[#allocation5 + $0x2f8] sm:$0xff]  ;;  %v420_v2 = vld [vmem:[#allocation5 + $0x88] sm:$0xff]  ;;  %v1926_v4 = vpack.c.bf16 %v493_v60, %v491_v55 }
  0x7b   : > { %1915 = vmatpush1.bf16.msra.mxu0 %v1914_v25  ;;  %1845 = vmatprep.subr.bf16.mxu1 %v1844_v51  ;;  %v422_v3 = vld [vmem:[#allocation5 + $0x98] sm:$0xff]  ;;  %v495_v5 = vld [vmem:[#allocation5 + $0x2e0] sm:$0xff]  ;;  %v497_v6 = vld [vmem:[#allocation5 + $0x2f0] sm:$0xff]  ;;  %v1850_v7 = vpack.c.bf16 %v417_v63, %v415_v62  ;;  %v1928_v8 = vpack.c.bf16 %v498_v1, %v496_v0 }
  0x7c   : > { %1917 = vmatprep.subr.bf16.mxu0 %v1916_v29  ;;  %v500_v9 = vld [vmem:[#allocation5 + $0x308] sm:$0xff]  ;;  %v1852_v10 = vpack.c.bf16 %v422_v3, %v420_v2  ;;  %v419_v11 = vld [vmem:[#allocation5 + $0x80] sm:$0xff]  ;;  %v421_v12 = vld [vmem:[#allocation5 + $0x90] sm:$0xff]  ;;  %v1930_v16 = vpack.c.bf16 %v497_v6, %v495_v5 }
  0x7d   : > { %v502_v13 = vld [vmem:[#allocation5 + $0x318] sm:$0xff]  ;;  %v424_v14 = vld [vmem:[#allocation5 + $0xa8] sm:$0xff]  ;;  %v499_v17 = vld [vmem:[#allocation5 + $0x300] sm:$0xff]  ;;  %v1854_v19 = vpack.c.bf16 %v421_v12, %v419_v11 }
  0x7e   : > { %1847 = vmatpush1.bf16.msra.mxu1 %v1846_v56  ;;  %v426_v15 = vld [vmem:[#allocation5 + $0xb8] sm:$0xff]  ;;  %v501_v18 = vld [vmem:[#allocation5 + $0x310] sm:$0xff]  ;;  %v1932_v20 = vpack.c.bf16 %v502_v13, %v500_v9  ;;  %v504_v21 = vld [vmem:[#allocation5 + $0x328] sm:$0xff] }
  0x7f   : > { %1919 = vmatpush1.bf16.msra.mxu0 %v1918_v41  ;;  %1849 = vmatprep.subr.bf16.mxu1 %v1848_v61  ;;  %v1856_v22 = vpack.c.bf16 %v426_v15, %v424_v14  ;;  %v423_v23 = vld [vmem:[#allocation5 + $0xa0] sm:$0xff]  ;;  %v425_v24 = vld [vmem:[#allocation5 + $0xb0] sm:$0xff]  ;;  %v506_v25 = vld [vmem:[#allocation5 + $0x338] sm:$0xff]  ;;  %v1934_v28 = vpack.c.bf16 %v501_v18, %v499_v17 }
  0x80   : > { %1921 = vmatprep.subr.bf16.mxu0 %v1920_v46  ;;  %v428_v26 = vld [vmem:[#allocation5 + $0xc8] sm:$0xff]  ;;  %v430_v27 = vld [vmem:[#allocation5 + $0xd8] sm:$0xff]  ;;  %v503_v29 = vld [vmem:[#allocation5 + $0x320] sm:$0xff]  ;;  %v1858_v31 = vpack.c.bf16 %v425_v24, %v423_v23  ;;  %v1936_v33 = vpack.c.bf16 %v506_v25, %v504_v21 }
  0x81   : > { %v505_v30 = vld [vmem:[#allocation5 + $0x330] sm:$0xff]  ;;  %v278_v32 = vld [vmem:[%s2767_s6 + $0x18] sm:$0xff]  ;;  %v508_v34 = vld [vmem:[#allocation5 + $0x348] sm:$0xff]  ;;  %v1860_v35 = vpack.c.bf16 %v430_v27, %v428_v26 }
  0x82   : > { %1851 = vmatpush1.bf16.msra.mxu1 %v1850_v7  ;;  %v427_v36 = vld [vmem:[#allocation5 + $0xc0] sm:$0xff]  ;;  %v429_v37 = vld [vmem:[#allocation5 + $0xd0] sm:$0xff]  ;;  %v510_v38 = vld [vmem:[#allocation5 + $0x358] sm:$0xff]  ;;  %929 = vmatprep.mubr.f32.mxu0 %v278_v32  ;;  %v1938_v41 = vpack.c.bf16 %v505_v30, %v503_v29 }
  0x83   : > { %1923 = vmatpush1.bf16.msra.mxu0 %v1922_v54  ;;  %1853 = vmatprep.subr.bf16.mxu1 %v1852_v10  ;;  %v432_v39 = vld [vmem:[#allocation5 + $0xe8] sm:$0xff]  ;;  %v434_v40 = vld [vmem:[#allocation5 + $0xf8] sm:$0xff]  ;;  %v507_v42 = vld [vmem:[#allocation5 + $0x340] sm:$0xff]  ;;  %v1862_v44 = vpack.c.bf16 %v429_v37, %v427_v36  ;;  %v1940_v45 = vpack.c.bf16 %v510_v38, %v508_v34 }
  0x84   : > { %1925 = vmatprep.subr.bf16.mxu0 %v1924_v59  ;;  %v509_v43 = vld [vmem:[#allocation5 + $0x350] sm:$0xff]  ;;  %v512_v46 = vld [vmem:[#allocation5 + $0x368] sm:$0xff]  ;;  %v1864_v47 = vpack.c.bf16 %v434_v40, %v432_v39  ;;  %v431_v48 = vld [vmem:[#allocation5 + $0xe0] sm:$0xff] }
  0x85   : > { %v433_v49 = vld [vmem:[#allocation5 + $0xf0] sm:$0xff]  ;;  %v514_v50 = vld [vmem:[#allocation5 + $0x378] sm:$0xff]  ;;  %v436_v51 = vld [vmem:[#allocation5 + $0x108] sm:$0xff]  ;;  %v1942_v53 = vpack.c.bf16 %v509_v43, %v507_v42 }
  0x86   : > { %1855 = vmatpush1.bf16.msra.mxu1 %v1854_v19  ;;  %v438_v52 = vld [vmem:[#allocation5 + $0x118] sm:$0xff]  ;;  %v511_v54 = vld [vmem:[#allocation5 + $0x360] sm:$0xff]  ;;  %v513_v55 = vld [vmem:[#allocation5 + $0x370] sm:$0xff]  ;;  %v1866_v56 = vpack.c.bf16 %v433_v49, %v431_v48  ;;  %v1944_v57 = vpack.c.bf16 %v514_v50, %v512_v46 }
  0x87   : > { %1927 = vmatpush1.bf16.msra.mxu0 %v1926_v4  ;;  %1857 = vmatprep.subr.bf16.mxu1 %v1856_v22  ;;  %v516_v58 = vld [vmem:[#allocation5 + $0x388] sm:$0xff]  ;;  %v1868_v59 = vpack.c.bf16 %v438_v52, %v436_v51  ;;  %v435_v60 = vld [vmem:[#allocation5 + $0x100] sm:$0xff]  ;;  %v437_v61 = vld [vmem:[#allocation5 + $0x110] sm:$0xff]  ;;  %v1946_v1 = vpack.c.bf16 %v513_v55, %v511_v54 }
  0x88   : > { %1929 = vmatprep.subr.bf16.mxu0 %v1928_v8  ;;  %v518_v62 = vld [vmem:[#allocation5 + $0x398] sm:$0xff]  ;;  %v440_v63 = vld [vmem:[#allocation5 + $0x128] sm:$0xff]  ;;  %v515_v2 = vld [vmem:[#allocation5 + $0x380] sm:$0xff]  ;;  %v1870_v4 = vpack.c.bf16 %v437_v61, %v435_v60 }
  0x89   : > { %v442_v0 = vld [vmem:[#allocation5 + $0x138] sm:$0xff]  ;;  %v517_v3 = vld [vmem:[#allocation5 + $0x390] sm:$0xff]  ;;  %v1948_v5 = vpack.c.bf16 %v518_v62, %v516_v58  ;;  %v520_v6 = vld [vmem:[#allocation5 + $0x3a8] sm:$0xff] }
  0x8a   : > { %1859 = vmatpush1.bf16.msra.mxu1 %v1858_v31  ;;  %v1872_v7 = vpack.c.bf16 %v442_v0, %v440_v63  ;;  %v439_v8 = vld [vmem:[#allocation5 + $0x120] sm:$0xff]  ;;  %v441_v9 = vld [vmem:[#allocation5 + $0x130] sm:$0xff]  ;;  %v522_v10 = vld [vmem:[#allocation5 + $0x3b8] sm:$0xff]  ;;  %v1950_v13 = vpack.c.bf16 %v517_v3, %v515_v2 }
  0x8b   : > { %1931 = vmatpush1.bf16.msra.mxu0 %v1930_v16  ;;  %1861 = vmatprep.subr.bf16.mxu1 %v1860_v35  ;;  %v444_v11 = vld [vmem:[#allocation5 + $0x148] sm:$0xff]  ;;  %v446_v12 = vld [vmem:[#allocation5 + $0x158] sm:$0xff]  ;;  %v519_v14 = vld [vmem:[#allocation5 + $0x3a0] sm:$0xff]  ;;  %v1874_v16 = vpack.c.bf16 %v441_v9, %v439_v8  ;;  %v1952_v17 = vpack.c.bf16 %v522_v10, %v520_v6 }
  0x8c   : > { %1933 = vmatprep.subr.bf16.mxu0 %v1932_v20  ;;  %v521_v15 = vld [vmem:[#allocation5 + $0x3b0] sm:$0xff]  ;;  %v524_v18 = vld [vmem:[#allocation5 + $0x3c8] sm:$0xff]  ;;  %v1876_v19 = vpack.c.bf16 %v446_v12, %v444_v11  ;;  %v443_v20 = vld [vmem:[#allocation5 + $0x140] sm:$0xff] }
  0x8d   : > { %v445_v21 = vld [vmem:[#allocation5 + $0x150] sm:$0xff]  ;;  %v526_v22 = vld [vmem:[#allocation5 + $0x3d8] sm:$0xff]  ;;  %v448_v23 = vld [vmem:[#allocation5 + $0x168] sm:$0xff]  ;;  %v1954_v25 = vpack.c.bf16 %v521_v15, %v519_v14 }
  0x8e   : > { %1863 = vmatpush1.bf16.msra.mxu1 %v1862_v44  ;;  %v450_v24 = vld [vmem:[#allocation5 + $0x178] sm:$0xff]  ;;  %v523_v26 = vld [vmem:[#allocation5 + $0x3c0] sm:$0xff]  ;;  %v525_v27 = vld [vmem:[#allocation5 + $0x3d0] sm:$0xff]  ;;  %v1956_v29 = vpack.c.bf16 %v526_v22, %v524_v18 }
  0x8f   : > { %1935 = vmatpush1.bf16.msra.mxu0 %v1934_v28  ;;  %1865 = vmatprep.subr.bf16.mxu1 %v1864_v47  ;;  %v1878_v28 = vpack.c.bf16 %v445_v21, %v443_v20  ;;  %v528_v30 = vld [vmem:[#allocation5 + $0x3e8] sm:$0xff]  ;;  %v1880_v31 = vpack.c.bf16 %v450_v24, %v448_v23  ;;  %v447_v32 = vld [vmem:[#allocation5 + $0x160] sm:$0xff]  ;;  %v530_v34 = vld [vmem:[#allocation5 + $0x3f8] sm:$0xff]  ;;  %v1958_v37 = vpack.c.bf16 %v525_v27, %v523_v26 }
  0x90   : > { %1937 = vmatprep.subr.bf16.mxu0 %v1936_v33  ;;  %v449_v33 = vld [vmem:[#allocation5 + $0x170] sm:$0xff]  ;;  %v452_v35 = vld [vmem:[#allocation5 + $0x188] sm:$0xff]  ;;  %v454_v36 = vld [vmem:[#allocation5 + $0x198] sm:$0xff] }
  0x91   : > { %v527_v38 = vld [vmem:[#allocation5 + $0x3e0] sm:$0xff]  ;;  %v529_v39 = vld [vmem:[#allocation5 + $0x3f0] sm:$0xff]  ;;  %v1882_v40 = vpack.c.bf16 %v449_v33, %v447_v32  ;;  %v532_v42 = vld [vmem:[#allocation5 + $0x408] sm:$0xff]  ;;  %v1884_v43 = vpack.c.bf16 %v454_v36, %v452_v35 }
  0x92   : > { %1867 = vmatpush1.bf16.msra.mxu1 %v1866_v56  ;;  %v451_v44 = vld [vmem:[#allocation5 + $0x180] sm:$0xff]  ;;  %v534_v46 = vld [vmem:[#allocation5 + $0x418] sm:$0xff]  ;;  %v456_v47 = vld [vmem:[#allocation5 + $0x1a8] sm:$0xff]  ;;  %v1962_v49 = vpack.c.bf16 %v529_v39, %v527_v38 }
  0x93   : > { %1939 = vmatpush1.bf16.msra.mxu0 %v1938_v41  ;;  %1869 = vmatprep.subr.bf16.mxu1 %v1868_v59  ;;  %v1960_v41 = vpack.c.bf16 %v530_v34, %v528_v30  ;;  %v458_v48 = vld [vmem:[#allocation5 + $0x1b8] sm:$0xff]  ;;  %v276_v51 = vld [vmem:[%s2767_s6 + $0x8] sm:$0xff]  ;;  %v1964_v52 = vpack.c.bf16 %v534_v46, %v532_v42  ;;  %v533_v54 = vld [vmem:[#allocation5 + $0x410] sm:$0xff] }
  0x94   : > { %1941 = vmatprep.subr.bf16.mxu0 %v1940_v45  ;;  %v453_v45 = vld [vmem:[#allocation5 + $0x190] sm:$0xff]  ;;  %v536_v55 = vld [vmem:[#allocation5 + $0x428] sm:$0xff]  ;;  %v1888_v56 = vpack.c.bf16 %v458_v48, %v456_v47  ;;  %v455_v58 = vld [vmem:[#allocation5 + $0x1a0] sm:$0xff]  ;;  %768 = vmatprep.mubr.f32.mxu1 %v276_v51 }
  0x95   : > { %v1886_v50 = vpack.c.bf16 %v453_v45, %v451_v44  ;;  %v457_v59 = vld [vmem:[#allocation5 + $0x1b0] sm:$0xff]  ;;  %v460_v60 = vld [vmem:[#allocation5 + $0x1c8] sm:$0xff]  ;;  %v462_v61 = vld [vmem:[#allocation5 + $0x1d8] sm:$0xff] }
  0x96   : > { %1871 = vmatpush1.bf16.msra.mxu1 %v1870_v4  ;;  %v277_v62 = vld [vmem:[%s2767_s6 + $0x10] sm:$0xff]  ;;  %v286_v0 = vld [vmem:[%s2767_s6 + $0x58] sm:$0xff]  ;;  %v535_v2 = vld [vmem:[#allocation5 + $0x420] sm:$0xff] }
  0x97   : > { %1943 = vmatpush1.bf16.msra.mxu0 %v1942_v53  ;;  %1873 = vmatprep.subr.bf16.mxu1 %v1872_v7  ;;  %v531_v53 = vld [vmem:[#allocation5 + $0x400] sm:$0xff]  ;;  %v537_v3 = vld [vmem:[#allocation5 + $0x430] sm:$0xff]  ;;  %v540_v4 = vld [vmem:[#allocation5 + $0x448] sm:$0xff]  ;;  %v1892_v7 = vpack.c.bf16 %v462_v61, %v460_v60 }
  0x98   : > { %1945 = vmatprep.subr.bf16.mxu0 %v1944_v57  ;;  %v538_v57 = vld [vmem:[#allocation5 + $0x438] sm:$0xff]  ;;  %v1966_v63 = vpack.c.bf16 %v533_v54, %v531_v53  ;;  %v459_v8 = vld [vmem:[#allocation5 + $0x1c0] sm:$0xff]  ;;  %v461_v9 = vld [vmem:[#allocation5 + $0x1d0] sm:$0xff] }
  0x99   : > { %v542_v6 = vld [vmem:[#allocation5 + $0x458] sm:$0xff]  ;;  %v464_v10 = vld [vmem:[#allocation5 + $0x1e8] sm:$0xff]  ;;  %v285_v12 = vld [vmem:[%s2767_s6 + $0x50] sm:$0xff] }
  0x9a   : > { %1875 = vmatpush1.bf16.msra.mxu1 %v1874_v16  ;;  %v466_v11 = vld [vmem:[#allocation5 + $0x1f8] sm:$0xff]  ;;  %v1972_v15 = vpack.c.bf16 %v542_v6, %v540_v4  ;;  %v539_v16 = vld [vmem:[#allocation5 + $0x440] sm:$0xff]  ;;  %v544_v18 = vld [vmem:[#allocation5 + $0x468] sm:$0xff] }
  0x9b   : > { %1947 = vmatpush1.bf16.msra.mxu0 %v1946_v1  ;;  %1877 = vmatprep.subr.bf16.mxu1 %v1876_v19  ;;  %v1968_v1 = vpack.c.bf16 %v538_v57, %v536_v55  ;;  %v294_v14 = vld [vmem:[%s2767_s6 + $0x98] sm:$0xff]  ;;  %v1894_v19 = vpack.c.bf16 %v461_v9, %v459_v8  ;;  %v1896_v21 = vpack.c.bf16 %v466_v11, %v464_v10  ;;  %v463_v22 = vld [vmem:[#allocation5 + $0x1e0] sm:$0xff]  ;;  %v465_v23 = vld [vmem:[#allocation5 + $0x1f0] sm:$0xff] }
  0x9c   : > { %1949 = vmatprep.subr.bf16.mxu0 %v1948_v5  ;;  %v1890_v5 = vpack.c.bf16 %v457_v59, %v455_v58  ;;  %v546_v20 = vld [vmem:[#allocation5 + $0x478] sm:$0xff]  ;;  %v596_v24 = vld [vmem:[#allocation5 + $0x608] sm:$0xff]  ;;  %v293_v26 = vld [vmem:[%s2767_s6 + $0x90] sm:$0xff]  ;;  %v1898_v32 = vpack.c.bf16 %v465_v23, %v463_v22 }
  0x9d   : > { %v543_v30 = vld [vmem:[#allocation5 + $0x460] sm:$0xff]  ;;  %v548_v33 = vld [vmem:[#allocation5 + $0x488] sm:$0xff]  ;;  %v550_v34 = vld [vmem:[#allocation5 + $0x498] sm:$0xff] }
  0x9e   : > { %1879 = vmatpush1.bf16.msra.mxu1 %v1878_v28  ;;  %v302_v28 = vld [vmem:[%s2767_s6 + $0xd8] sm:$0xff]  ;;  %v595_v36 = vld [vmem:[#allocation5 + $0x600] sm:$0xff]  ;;  %v301_v38 = vld [vmem:[%s2767_s6 + $0xd0] sm:$0xff] }
  0x9f   : > { %1951 = vmatpush1.bf16.msra.mxu0 %v1950_v13  ;;  %1881 = vmatprep.subr.bf16.mxu1 %v1880_v31  ;;  %v1970_v13 = vpack.c.bf16 %v537_v3, %v535_v2  ;;  %v545_v31 = vld [vmem:[#allocation5 + $0x470] sm:$0xff]  ;;  %v310_v42 = vld [vmem:[%s2767_s6 + $0x118] sm:$0xff]  ;;  %v547_v44 = vld [vmem:[#allocation5 + $0x480] sm:$0xff] }
  0xa0   : > { %1953 = vmatprep.subr.bf16.mxu0 %v1952_v17  ;;  %v541_v17 = vld [vmem:[#allocation5 + $0x450] sm:$0xff]  ;;  %v1978_v39 = vpack.c.bf16 %v545_v31, %v543_v30  ;;  %v552_v46 = vld [vmem:[#allocation5 + $0x4a8] sm:$0xff]  ;;  %v554_v47 = vld [vmem:[#allocation5 + $0x4b8] sm:$0xff] }
  0xa1   : > { %v1974_v27 = vpack.c.bf16 %v541_v17, %v539_v16  ;;  %v549_v45 = vld [vmem:[#allocation5 + $0x490] sm:$0xff]  ;;  %v275_v48 = vld [vmem:[%s2767_s6] sm:$0xff]  ;;  %v606_v57 = vld [vmem:[#allocation5 + $0x658] sm:$0xff]  ;;  %v1984_v59 = vpack.c.bf16 %v554_v47, %v552_v46 }
  0xa2   : > { %1883 = vmatpush1.bf16.msra.mxu1 %v1882_v40  ;;  %v600_v40 = vld [vmem:[#allocation5 + $0x628] sm:$0xff]  ;;  %v601_v53 = vld [vmem:[#allocation5 + $0x630] sm:$0xff]  ;;  %v1982_v55 = vpack.c.bf16 %v549_v45, %v547_v44  ;;  %v318_v58 = vld [vmem:[%s2767_s6 + $0x158] sm:$0xff] }
  0xa3   : > { %1955 = vmatpush1.bf16.msra.mxu0 %v1954_v25  ;;  %1885 = vmatprep.subr.bf16.mxu1 %v1884_v43  ;;  %v598_v25 = vld [vmem:[#allocation5 + $0x618] sm:$0xff]  ;;  %v1980_v43 = vpack.c.bf16 %v550_v34, %v548_v33  ;;  %v309_v54 = vld [vmem:[%s2767_s6 + $0x110] sm:$0xff]  ;;  %v551_v60 = vld [vmem:[#allocation5 + $0x4a0] sm:$0xff] }
  0xa4   : > { %1957 = vmatprep.subr.bf16.mxu0 %v1956_v29  ;;  %v1976_v29 = vpack.c.bf16 %v546_v20, %v544_v18  ;;  %v2785_v35 = vpack.c.bf16 %v598_v25, %v596_v24  ;;  %v553_v61 = vld [vmem:[#allocation5 + $0x4b0] sm:$0xff]  ;;  %v292_v2 = vld [vmem:[%s2767_s6 + $0x88] sm:$0xff]  ;;  %v603_v4 = vld [vmem:[#allocation5 + $0x640] sm:$0xff] }
  0xa5   : > { %v317_v6 = vld [vmem:[%s2767_s6 + $0x150] sm:$0xff]  ;;  %v608_v8 = vld [vmem:[#allocation5 + $0x668] sm:$0xff]  ;;  %v610_v9 = vld [vmem:[#allocation5 + $0x678] sm:$0xff] }
  0xa6   : > { %1887 = vmatpush1.bf16.msra.mxu1 %v1886_v50  ;;  %v284_v50 = vld [vmem:[%s2767_s6 + $0x48] sm:$0xff]  ;;  %v326_v10 = vld [vmem:[%s2767_s6 + $0x198] sm:$0xff]  ;;  %v291_v16 = vld [vmem:[%s2767_s6 + $0x80] sm:$0xff] }
  0xa7   : > { %1959 = vmatpush1.bf16.msra.mxu0 %v1958_v37  ;;  %1889 = vmatprep.subr.bf16.mxu1 %v1888_v56  ;;  %v597_v37 = vld [vmem:[#allocation5 + $0x610] sm:$0xff]  ;;  %v604_v56 = vld [vmem:[#allocation5 + $0x648] sm:$0xff]  ;;  %v607_v20 = vld [vmem:[#allocation5 + $0x660] sm:$0xff] }
  0xa8   : > { %1961 = vmatprep.subr.bf16.mxu0 %v1960_v41  ;;  %v602_v41 = vld [vmem:[#allocation5 + $0x638] sm:$0xff]  ;;  %v2804_v3 = vpack.c.bf16 %v606_v57, %v604_v56  ;;  %v300_v18 = vld [vmem:[%s2767_s6 + $0xc8] sm:$0xff]  ;;  %v325_v22 = vld [vmem:[%s2767_s6 + $0x190] sm:$0xff] }
  0xa9   : > { %v2794_v51 = vpack.c.bf16 %v602_v41, %v600_v40  ;;  %v612_v24 = vld [vmem:[#allocation5 + $0x688] sm:$0xff]  ;;  %v614_v25 = vld [vmem:[#allocation5 + $0x698] sm:$0xff]  ;;  %v563_v45 = vld [vmem:[#allocation5 + $0x500] sm:$0xff] }
  0xaa   : > { %1891 = vmatpush1.bf16.msra.mxu1 %v1890_v5  ;;  %v605_v5 = vld [vmem:[#allocation5 + $0x650] sm:$0xff]  ;;  %v564_v30 = vld [vmem:[#allocation5 + $0x508] sm:$0xff]  ;;  %v566_v31 = vld [vmem:[#allocation5 + $0x518] sm:$0xff] }
  0xab   : > { %1963 = vmatpush1.bf16.msra.mxu0 %v1962_v49  ;;  %1893 = vmatprep.subr.bf16.mxu1 %v1892_v7  ;;  %v2791_v49 = vpack.c.bf16 %v597_v37, %v595_v36  ;;  %v1986_v7 = vpack.c.bf16 %v553_v61, %v551_v60  ;;  %v2810_v17 = vpack.c.bf16 %v605_v5, %v603_v4  ;;  %v308_v34 = vld [vmem:[%s2767_s6 + $0x108] sm:$0xff]  ;;  %v611_v37 = vld [vmem:[#allocation5 + $0x680] sm:$0xff]  ;;  %v565_v46 = vld [vmem:[#allocation5 + $0x510] sm:$0xff] }
  0xac   : > { %1965 = vmatprep.subr.bf16.mxu0 %v1964_v52  ;;  %v599_v52 = vld [vmem:[#allocation5 + $0x620] sm:$0xff]  ;;  %v2824_v36 = vpack.c.bf16 %v614_v25, %v612_v24  ;;  %v616_v41 = vld [vmem:[#allocation5 + $0x6a8] sm:$0xff]  ;;  %v1996_v44 = vpack.c.bf16 %v566_v31, %v564_v30  ;;  %v617_v56 = vld [vmem:[#allocation5 + $0x6b0] sm:$0xff] }
  0xad   : > { %v568_v47 = vld [vmem:[#allocation5 + $0x528] sm:$0xff]  ;;  %v341_v57 = vld [vmem:[%s2767_s6 + $0x210] sm:$0xff]  ;;  %v622_v60 = vld [vmem:[#allocation5 + $0x6d8] sm:$0xff] }
  0xae   : > { %930 = vmatmul.mubr.f32.vlgmr.msra.gmra.mrb[0].mxu0 %v277_v62  ;;  %1895 = vmatpush1.bf16.msra.mxu1 %v1894_v19  ;;  %v556_v62 = vld [vmem:[#allocation5 + $0x4c8] sm:$0xff]  ;;  %v2814_v19 = vpack.c.bf16 %v610_v9, %v608_v8  ;;  %v350_v61 = vld [vmem:[%s2767_s6 + $0x258] sm:$0xff]  ;;  %v315_v5 = vld [vmem:[%s2767_s6 + $0x140] sm:$0xff] }
  0xaf   : > { %1967 = vmatpush1.bf16.msra.mxu0 %v1966_v63  ;;  %935 = vmatprep.mubr.f32.mxu0 %v286_v0  ;;  %v558_v63 = vld [vmem:[#allocation5 + $0x4d8] sm:$0xff]  ;;  %v283_v0 = vld [vmem:[%s2767_s6 + $0x40] sm:$0xff]  ;;  %v332_v25 = vld [vmem:[%s2767_s6 + $0x1c8] sm:$0xff] }
  0xb0   : > { %1969 = vmatprep.subr.bf16.mxu0 %v1968_v1  ;;  %1897 = vmatprep.subr.bf16.mxu1 %v1896_v21  ;;  %v2800_v1 = vpack.c.bf16 %v601_v53, %v599_v52  ;;  %v1988_v11 = vpack.c.bf16 %v558_v63, %v556_v62  ;;  %v609_v21 = vld [vmem:[#allocation5 + $0x670] sm:$0xff]  ;;  %v316_v53 = vld [vmem:[%s2767_s6 + $0x148] sm:$0xff]  ;;  %v567_v63 = vld [vmem:[#allocation5 + $0x520] sm:$0xff] }
  0xb1   : > { %v2820_v33 = vpack.c.bf16 %v609_v21, %v607_v20  ;;  %v574_v4 = vld [vmem:[#allocation5 + $0x558] sm:$0xff]  ;;  %v619_v9 = vld [vmem:[#allocation5 + $0x6c0] sm:$0xff]  ;;  %v573_v20 = vld [vmem:[#allocation5 + $0x550] sm:$0xff] }
  0xb2   : > { %936 = vmatmul.mubr.f32.gmra.mrb[2].mxu0 %v285_v12  ;;  %1899 = vmatpush1.bf16.msra.mxu1 %v1898_v32  ;;  %v555_v12 = vld [vmem:[#allocation5 + $0x4c0] sm:$0xff]  ;;  %v576_v21 = vld [vmem:[#allocation5 + $0x568] sm:$0xff] }
  0xb3   : > { %1971 = vmatpush1.bf16.msra.mxu0 %v1970_v13  ;;  %941 = vmatprep.mubr.f32.mxu0 %v294_v14  ;;  %v557_v13 = vld [vmem:[#allocation5 + $0x4d0] sm:$0xff]  ;;  %v560_v14 = vld [vmem:[#allocation5 + $0x4e8] sm:$0xff]  ;;  %v299_v32 = vld [vmem:[%s2767_s6 + $0xc0] sm:$0xff] }
  0xb4   : > { %1973 = vmatprep.subr.bf16.mxu0 %v1972_v15  ;;  %2124 = vmatprep.subr.bf16.mxu1 %v2785_v35  ;;  %v562_v15 = vld [vmem:[#allocation5 + $0x4f8] sm:$0xff]  ;;  %v1990_v23 = vpack.c.bf16 %v557_v13, %v555_v12  ;;  %v624_v13 = vld [vmem:[#allocation5 + $0x6e8] sm:$0xff] }
  0xb5   : > { %769 = vmatmul.mubr.f32.vlgmr.msra.gmra.mrb[0].mxu1 %v275_v48  ;;  %v570_v48 = vld [vmem:[#allocation5 + $0x538] sm:$0xff]  ;;  %v628_v31 = vld [vmem:[#allocation5 + $0x708] sm:$0xff] }
  0xb6   : > { %942 = vmatmul.mubr.f32.gmra.mrb[4].mxu0 %v293_v26  ;;  %2140 = vmatpush1.bf16.msra.mxu1 %v2791_v49  ;;  %v334_v26 = vld [vmem:[%s2767_s6 + $0x1d8] sm:$0xff]  ;;  %v2000_v62 = vpack.c.bf16 %v570_v48, %v568_v47  ;;  %v629_v47 = vld [vmem:[#allocation5 + $0x710] sm:$0xff] }
  0xb7   : > { %1975 = vmatpush1.bf16.msra.mxu0 %v1974_v27  ;;  %947 = vmatprep.mubr.f32.mxu0 %v302_v28  ;;  %v1992_v27 = vpack.c.bf16 %v562_v15, %v560_v14  ;;  %v559_v28 = vld [vmem:[#allocation5 + $0x4e0] sm:$0xff]  ;;  %v626_v14 = vld [vmem:[#allocation5 + $0x6f8] sm:$0xff]  ;;  %v365_v48 = vld [vmem:[%s2767_s6 + $0x2d0] sm:$0xff] }
  0xb8   : > { %1977 = vmatprep.subr.bf16.mxu0 %v1976_v29  ;;  %774 = vmatprep.mubr.f32.mxu1 %v284_v50  ;;  %v561_v29 = vld [vmem:[#allocation5 + $0x4f0] sm:$0xff]  ;;  %v307_v50 = vld [vmem:[%s2767_s6 + $0x100] sm:$0xff]  ;;  %v358_v15 = vld [vmem:[%s2767_s6 + $0x298] sm:$0xff] }
  0xb9   : > { %2125 = vmatprep.subr.bf16.mxu1 %v2794_v51  ;;  %775 = vmatmul.mubr.f32.gmra.mrb[2].mxu1 %v283_v0  ;;  %v1994_v40 = vpack.c.bf16 %v561_v29, %v559_v28  ;;  %v569_v0 = vld [vmem:[#allocation5 + $0x530] sm:$0xff] }
  0xba   : > { %948 = vmatmul.mubr.f32.gmra.mrb[6].mxu0 %v301_v38  ;;  %2141 = vmatpush1.bf16.msra.mxu1 %v2800_v1  ;;  %v613_v38 = vld [vmem:[#allocation5 + $0x690] sm:$0xff]  ;;  %v2002_v12 = vpack.c.bf16 %v569_v0, %v567_v63  ;;  %v348_v0 = vld [vmem:[%s2767_s6 + $0x248] sm:$0xff] }
  0xbb   : > { %1979 = vmatpush1.bf16.msra.mxu0 %v1978_v39  ;;  %953 = vmatprep.mubr.f32.mxu0 %v310_v42  ;;  %v333_v39 = vld [vmem:[%s2767_s6 + $0x1d0] sm:$0xff]  ;;  %v618_v42 = vld [vmem:[#allocation5 + $0x6b8] sm:$0xff]  ;;  %v2830_v52 = vpack.c.bf16 %v613_v38, %v611_v37  ;;  %v575_v38 = vld [vmem:[#allocation5 + $0x560] sm:$0xff] }
  0xbc   : > { %1981 = vmatprep.subr.bf16.mxu0 %v1980_v43  ;;  %780 = vmatprep.mubr.f32.mxu1 %v292_v2  ;;  %v342_v43 = vld [vmem:[%s2767_s6 + $0x218] sm:$0xff]  ;;  %v572_v2 = vld [vmem:[#allocation5 + $0x548] sm:$0xff]  ;;  %v625_v28 = vld [vmem:[#allocation5 + $0x6f0] sm:$0xff] }
  0xbd   : > { %2126 = vmatprep.subr.bf16.mxu1 %v2804_v3  ;;  %781 = vmatmul.mubr.f32.gmra.mrb[4].mxu1 %v291_v16  ;;  %v2004_v16 = vpack.c.bf16 %v574_v4, %v572_v2  ;;  %v357_v29 = vld [vmem:[%s2767_s6 + $0x290] sm:$0xff]  ;;  %v631_v4 = vld [vmem:[#allocation5 + $0x720] sm:$0xff] }
  0xbe   : > { %954 = vmatmul.mubr.f32.gmra.mrb[8].mxu0 %v309_v54  ;;  %2142 = vmatpush1.bf16.msra.mxu1 %v2810_v17  ;;  %v2834_v54 = vpack.c.bf16 %v618_v42, %v616_v41  ;;  %v582_v41 = vld [vmem:[#allocation5 + $0x598] sm:$0xff]  ;;  %v331_v42 = vld [vmem:[%s2767_s6 + $0x1c0] sm:$0xff] }
  0xbf   : > { %1983 = vmatpush1.bf16.msra.mxu0 %v1982_v55  ;;  %959 = vmatprep.mubr.f32.mxu0 %v318_v58  ;;  %v615_v55 = vld [vmem:[#allocation5 + $0x6a0] sm:$0xff]  ;;  %v1998_v58 = vpack.c.bf16 %v565_v46, %v563_v45 }
  0xc0   : > { %1985 = vmatprep.subr.bf16.mxu0 %v1984_v59  ;;  %786 = vmatprep.mubr.f32.mxu1 %v300_v18  ;;  %v620_v59 = vld [vmem:[#allocation5 + $0x6c8] sm:$0xff]  ;;  %v571_v18 = vld [vmem:[#allocation5 + $0x540] sm:$0xff] }
  0xc1   : > { %2127 = vmatprep.subr.bf16.mxu1 %v2814_v19  ;;  %787 = vmatmul.mubr.f32.gmra.mrb[6].mxu1 %v299_v32  ;;  %v2844_v8 = vpack.c.bf16 %v622_v60, %v620_v59  ;;  %v2006_v30 = vpack.c.bf16 %v573_v20, %v571_v18  ;;  %v630_v32 = vld [vmem:[#allocation5 + $0x718] sm:$0xff]  ;;  %v627_v46 = vld [vmem:[#allocation5 + $0x700] sm:$0xff]  ;;  %v581_v59 = vld [vmem:[#allocation5 + $0x590] sm:$0xff] }
  0xc2   : > { %960 = vmatmul.mubr.f32.gmra.mrb[10].mxu0 %v317_v6  ;;  %2143 = vmatpush1.bf16.msra.mxu1 %v2820_v33  ;;  %v2840_v6 = vpack.c.bf16 %v617_v56, %v615_v55  ;;  %v2864_v45 = vpack.c.bf16 %v630_v32, %v628_v31  ;;  %v634_v55 = vld [vmem:[#allocation5 + $0x738] sm:$0xff]  ;;  %v584_v60 = vld [vmem:[#allocation5 + $0x5a8] sm:$0xff]  ;;  %v2870_v63 = vpack.c.bf16 %v629_v47, %v627_v46  ;;  %v347_v20 = vld [vmem:[%s2767_s6 + $0x240] sm:$0xff] }
  0xc3   : > { %1987 = vmatpush1.bf16.msra.mxu0 %v1986_v7  ;;  %965 = vmatprep.mubr.f32.mxu0 %v326_v10  ;;  %v324_v7 = vld [vmem:[%s2767_s6 + $0x188] sm:$0xff]  ;;  %v621_v10 = vld [vmem:[#allocation5 + $0x6d0] sm:$0xff]  ;;  %v374_v56 = vld [vmem:[%s2767_s6 + $0x318] sm:$0xff] }
  0xc4   : > { %1989 = vmatprep.subr.bf16.mxu0 %v1988_v11  ;;  %792 = vmatprep.mubr.f32.mxu1 %v308_v34  ;;  %v349_v11 = vld [vmem:[%s2767_s6 + $0x250] sm:$0xff]  ;;  %v2850_v24 = vpack.c.bf16 %v621_v10, %v619_v9  ;;  %v366_v34 = vld [vmem:[%s2767_s6 + $0x2d8] sm:$0xff]  ;;  %v636_v10 = vld [vmem:[#allocation5 + $0x748] sm:$0xff] }
  0xc5   : > { %2128 = vmatprep.subr.bf16.mxu1 %v2824_v36  ;;  %793 = vmatmul.mubr.f32.gmra.mrb[8].mxu1 %v307_v50  ;;  %v590_v18 = vld [vmem:[#allocation5 + $0x5d8] sm:$0xff]  ;;  %v639_v47 = vld [vmem:[#allocation5 + $0x760] sm:$0xff] }
  0xc6   : > { %966 = vmatmul.mubr.f32.gmra.mrb[12].mxu0 %v325_v22  ;;  %2144 = vmatpush1.bf16.msra.mxu1 %v2830_v52  ;;  %v578_v22 = vld [vmem:[#allocation5 + $0x578] sm:$0xff] }
  0xc7   : > { %1991 = vmatpush1.bf16.msra.mxu0 %v1990_v23  ;;  %971 = vmatprep.mubr.f32.mxu0 %v334_v26  ;;  %v323_v23 = vld [vmem:[%s2767_s6 + $0x180] sm:$0xff]  ;;  %v2854_v26 = vpack.c.bf16 %v626_v14, %v624_v13  ;;  %v2008_v37 = vpack.c.bf16 %v578_v22, %v576_v21  ;;  %v356_v22 = vld [vmem:[%s2767_s6 + $0x288] sm:$0xff]  ;;  %v642_v31 = vld [vmem:[#allocation5 + $0x778] sm:$0xff] }
  0xc8   : > { %1993 = vmatprep.subr.bf16.mxu0 %v1992_v27  ;;  %798 = vmatprep.mubr.f32.mxu1 %v316_v53  ;;  %v623_v27 = vld [vmem:[#allocation5 + $0x6e0] sm:$0xff]  ;;  %v632_v53 = vld [vmem:[#allocation5 + $0x728] sm:$0xff]  ;;  %v390_v32 = vld [vmem:[%s2767_s6 + $0x398] sm:$0xff] }
  0xc9   : > { %2129 = vmatprep.subr.bf16.mxu1 %v2834_v54  ;;  %799 = vmatmul.mubr.f32.gmra.mrb[10].mxu1 %v315_v5  ;;  %v2874_v2 = vpack.c.bf16 %v634_v55, %v632_v53  ;;  %v633_v5 = vld [vmem:[#allocation5 + $0x730] sm:$0xff]  ;;  %v583_v14 = vld [vmem:[#allocation5 + $0x5a0] sm:$0xff]  ;;  %v644_v55 = vld [vmem:[#allocation5 + $0x788] sm:$0xff] }
  0xca   : > { %972 = vmatmul.mubr.f32.gmra.mrb[14].mxu0 %v333_v39  ;;  %2145 = vmatpush1.bf16.msra.mxu1 %v2840_v6  ;;  %v577_v39 = vld [vmem:[#allocation5 + $0x570] sm:$0xff]  ;;  %v2880_v21 = vpack.c.bf16 %v633_v5, %v631_v4  ;;  %v643_v5 = vld [vmem:[#allocation5 + $0x780] sm:$0xff] }
  0xcb   : > { %1995 = vmatpush1.bf16.msra.mxu0 %v1994_v40  ;;  %977 = vmatprep.mubr.f32.mxu0 %v342_v43  ;;  %v580_v40 = vld [vmem:[#allocation5 + $0x588] sm:$0xff]  ;;  %v2860_v43 = vpack.c.bf16 %v625_v28, %v623_v27  ;;  %v2010_v50 = vpack.c.bf16 %v577_v39, %v575_v38  ;;  %v637_v27 = vld [vmem:[#allocation5 + $0x750] sm:$0xff] }
  0xcc   : > { %1997 = vmatprep.subr.bf16.mxu0 %v1996_v44  ;;  %804 = vmatprep.mubr.f32.mxu1 %v324_v7  ;;  %v340_v44 = vld [vmem:[%s2767_s6 + $0x208] sm:$0xff]  ;;  %v373_v7 = vld [vmem:[%s2767_s6 + $0x310] sm:$0xff] }
  0xcd   : > { %2130 = vmatprep.subr.bf16.mxu1 %v2844_v8  ;;  %805 = vmatmul.mubr.f32.gmra.mrb[12].mxu1 %v323_v23  ;;  %v381_v28 = vld [vmem:[%s2767_s6 + $0x350] sm:$0xff]  ;;  %v592_v39 = vld [vmem:[#allocation5 + $0x5e8] sm:$0xff] }
  0xce   : > { %978 = vmatmul.mubr.f32.gmra.mrb[16].mxu0 %v341_v57  ;;  %2146 = vmatpush1.bf16.msra.mxu1 %v2850_v24  ;;  %v2012_v57 = vpack.c.bf16 %v582_v41, %v580_v40  ;;  %v589_v38 = vld [vmem:[#allocation5 + $0x5d0] sm:$0xff]  ;;  %v594_v40 = vld [vmem:[#allocation5 + $0x5f8] sm:$0xff]  ;;  %v355_v41 = vld [vmem:[%s2767_s6 + $0x280] sm:$0xff] }
  0xcf   : > { %1999 = vmatpush1.bf16.msra.mxu0 %v1998_v58  ;;  %983 = vmatprep.mubr.f32.mxu0 %v350_v61  ;;  %v579_v58 = vld [vmem:[#allocation5 + $0x580] sm:$0xff]  ;;  %v586_v61 = vld [vmem:[#allocation5 + $0x5b8] sm:$0xff] }
  0xd0   : > { %2001 = vmatprep.subr.bf16.mxu0 %v2000_v62  ;;  %810 = vmatprep.mubr.f32.mxu1 %v332_v25  ;;  %v339_v62 = vld [vmem:[%s2767_s6 + $0x200] sm:$0xff]  ;;  %v2014_v9 = vpack.c.bf16 %v581_v59, %v579_v58  ;;  %v2016_v13 = vpack.c.bf16 %v586_v61, %v584_v60  ;;  %v2024_v58 = vpack.c.bf16 %v594_v40, %v592_v39  ;;  %v593_v60 = vld [vmem:[#allocation5 + $0x5f0] sm:$0xff]  ;;  %v656_v39 = vld [vmem:[#allocation5 + $0x7e8] sm:$0xff] }
  0xd1   : > { %2131 = vmatprep.subr.bf16.mxu1 %v2854_v26  ;;  %811 = vmatmul.mubr.f32.gmra.mrb[14].mxu1 %v331_v42  ;;  %v635_v25 = vld [vmem:[#allocation5 + $0x740] sm:$0xff]  ;;  %v658_v40 = vld [vmem:[#allocation5 + $0x7f8] sm:$0xff] }
  0xd2   : > { %984 = vmatmul.mubr.f32.gmra.mrb[18].mxu0 %v349_v11  ;;  %2147 = vmatpush1.bf16.msra.mxu1 %v2860_v43  ;;  %v638_v11 = vld [vmem:[#allocation5 + $0x758] sm:$0xff]  ;;  %v2890_v42 = vpack.c.bf16 %v637_v27, %v635_v25  ;;  %v591_v59 = vld [vmem:[#allocation5 + $0x5e0] sm:$0xff]  ;;  %v652_v27 = vld [vmem:[#allocation5 + $0x7c8] sm:$0xff] }
  0xd3   : > { %2003 = vmatpush1.bf16.msra.mxu0 %v2002_v12  ;;  %989 = vmatprep.mubr.f32.mxu0 %v358_v15  ;;  %v382_v12 = vld [vmem:[%s2767_s6 + $0x358] sm:$0xff]  ;;  %v585_v15 = vld [vmem:[#allocation5 + $0x5b0] sm:$0xff]  ;;  %v2884_v23 = vpack.c.bf16 %v638_v11, %v636_v10  ;;  %v363_v61 = vld [vmem:[%s2767_s6 + $0x2c0] sm:$0xff]  ;;  %v2026_v10 = vpack.c.bf16 %v593_v60, %v591_v59 }
  0xd4   : > { %2005 = vmatprep.subr.bf16.mxu0 %v2004_v16  ;;  %816 = vmatprep.mubr.f32.mxu1 %v340_v44  ;;  %v588_v16 = vld [vmem:[#allocation5 + $0x5c8] sm:$0xff]  ;;  %v279_v25 = vld [vmem:[%s2767_s6 + $0x20] sm:$0xff]  ;;  %v345_v59 = vld [vmem:[%s2767_s6 + $0x230] sm:$0xff] }
  0xd5   : > { %2132 = vmatprep.subr.bf16.mxu1 %v2864_v45  ;;  %817 = vmatmul.mubr.f32.gmra.mrb[16].mxu1 %v339_v62  ;;  %v364_v44 = vld [vmem:[%s2767_s6 + $0x2c8] sm:$0xff]  ;;  %v354_v60 = vld [vmem:[%s2767_s6 + $0x278] sm:$0xff] }
  0xd6   : > { %990 = vmatmul.mubr.f32.gmra.mrb[20].mxu0 %v357_v29  ;;  %2148 = vmatpush1.bf16.msra.mxu1 %v2870_v63  ;;  %v2018_v29 = vpack.c.bf16 %v585_v15, %v583_v14  ;;  %v648_v11 = vld [vmem:[#allocation5 + $0x7a8] sm:$0xff]  ;;  %v371_v14 = vld [vmem:[%s2767_s6 + $0x300] sm:$0xff] }
  0xd7   : > { %2007 = vmatpush1.bf16.msra.mxu0 %v2006_v30  ;;  %995 = vmatprep.mubr.f32.mxu0 %v366_v34  ;;  %v640_v30 = vld [vmem:[#allocation5 + $0x768] sm:$0xff]  ;;  %v2020_v34 = vpack.c.bf16 %v590_v18, %v588_v16 }
  0xd8   : > { %2009 = vmatprep.subr.bf16.mxu0 %v2008_v37  ;;  %822 = vmatprep.mubr.f32.mxu1 %v348_v0  ;;  %v587_v37 = vld [vmem:[#allocation5 + $0x5c0] sm:$0xff]  ;;  %v2894_v46 = vpack.c.bf16 %v642_v31, %v640_v30  ;;  %v372_v0 = vld [vmem:[%s2767_s6 + $0x308] sm:$0xff] }
  0xd9   : > { %2133 = vmatprep.subr.bf16.mxu1 %v2874_v2  ;;  %823 = vmatmul.mubr.f32.gmra.mrb[18].mxu1 %v347_v20  ;;  %v2022_v53 = vpack.c.bf16 %v589_v38, %v587_v37  ;;  %v380_v16 = vld [vmem:[%s2767_s6 + $0x348] sm:$0xff]  ;;  %v647_v20 = vld [vmem:[#allocation5 + $0x7a0] sm:$0xff]  ;;  %v653_v38 = vld [vmem:[#allocation5 + $0x7d0] sm:$0xff] }
  0xda   : > { %996 = vmatmul.mubr.f32.gmra.mrb[22].mxu0 %v365_v48  ;;  %2149 = vmatpush1.bf16.msra.mxu1 %v2880_v21  ;;  %v641_v48 = vld [vmem:[#allocation5 + $0x770] sm:$0xff]  ;;  %v379_v30 = vld [vmem:[%s2767_s6 + $0x340] sm:$0xff] }
  0xdb   : > { %2011 = vmatpush1.bf16.msra.mxu0 %v2010_v50  ;;  %1001 = vmatprep.mubr.f32.mxu0 %v374_v56  ;;  %v389_v50 = vld [vmem:[%s2767_s6 + $0x390] sm:$0xff]  ;;  %v646_v56 = vld [vmem:[#allocation5 + $0x798] sm:$0xff]  ;;  %v2900_v62 = vpack.c.bf16 %v641_v48, %v639_v47  ;;  %v651_v37 = vld [vmem:[#allocation5 + $0x7c0] sm:$0xff]  ;;  %v2937_v48 = vpack.c.bf16 %v658_v40, %v656_v39 }
  0xdc   : > { %2013 = vmatprep.subr.bf16.mxu0 %v2012_v57  ;;  %828 = vmatprep.mubr.f32.mxu1 %v356_v22  ;;  %v398_v57 = vld [vmem:[%s2767_s6 + $0x3d8] sm:$0xff]  ;;  %v2904_v4 = vpack.c.bf16 %v646_v56, %v644_v55  ;;  %v649_v22 = vld [vmem:[#allocation5 + $0x7b0] sm:$0xff]  ;;  %v2933_v47 = vpack.c.bf16 %v653_v38, %v651_v37  ;;  %v304_v55 = vld [vmem:[%s2767_s6 + $0xe8] sm:$0xff] }
  0xdd   : > { %2134 = vmatprep.subr.bf16.mxu1 %v2884_v23  ;;  %829 = vmatmul.mubr.f32.gmra.mrb[20].mxu1 %v355_v41  ;;  %v2921_v31 = vpack.c.bf16 %v649_v22, %v647_v20  ;;  %v296_v41 = vld [vmem:[%s2767_s6 + $0xa8] sm:$0xff]  ;;  %v395_v56 = vld [vmem:[%s2767_s6 + $0x3c0] sm:$0xff]  ;;  %v402_v20 = vld [vmem:[%s2767_s6 + $0x3f8] sm:$0xff] }
  0xde   : > { %1002 = vmatmul.mubr.f32.gmra.mrb[24].mxu0 %v373_v7  ;;  %2150 = vmatpush1.bf16.msra.mxu1 %v2890_v42  ;;  %v645_v7 = vld [vmem:[#allocation5 + $0x790] sm:$0xff]  ;;  %v359_v22 = vld [vmem:[%s2767_s6 + $0x2a0] sm:$0xff]  ;;  %v314_v38 = vld [vmem:[%s2767_s6 + $0x138] sm:$0xff] }
  0xdf   : > { %2015 = vmatpush1.bf16.msra.mxu0 %v2014_v9  ;;  %1007 = vmatprep.mubr.f32.mxu0 %v382_v12  ;;  %v397_v9 = vld [vmem:[%s2767_s6 + $0x3d0] sm:$0xff]  ;;  %v650_v12 = vld [vmem:[#allocation5 + $0x7b8] sm:$0xff]  ;;  %v2910_v15 = vpack.c.bf16 %v645_v7, %v643_v5  ;;  %v319_v5 = vld [vmem:[%s2767_s6 + $0x160] sm:$0xff] }
  0xe0   : > { %2017 = vmatprep.subr.bf16.mxu0 %v2016_v13  ;;  %834 = vmatprep.mubr.f32.mxu1 %v364_v44  ;;  %v280_v13 = vld [vmem:[%s2767_s6 + $0x28] sm:$0xff]  ;;  %v2914_v18 = vpack.c.bf16 %v650_v12, %v648_v11  ;;  %v387_v44 = vld [vmem:[%s2767_s6 + $0x380] sm:$0xff]  ;;  %v370_v7 = vld [vmem:[%s2767_s6 + $0x2f8] sm:$0xff] }
  0xe1   : > { %2135 = vmatprep.subr.bf16.mxu1 %v2894_v46  ;;  %835 = vmatmul.mubr.f32.gmra.mrb[22].mxu1 %v363_v61  ;;  %v353_v61 = vld [vmem:[%s2767_s6 + $0x270] sm:$0xff]  ;;  %v335_v11 = vld [vmem:[%s2767_s6 + $0x1e0] sm:$0xff]  ;;  %v386_v12 = vld [vmem:[%s2767_s6 + $0x378] sm:$0xff] }
  0xe2   : > { %1008 = vmatmul.mubr.f32.gmra.mrb[26].mxu0 %v381_v28  ;;  %2151 = vmatpush1.bf16.msra.mxu1 %v2900_v62  ;;  %v654_v28 = vld [vmem:[#allocation5 + $0x7d8] sm:$0xff]  ;;  %v305_v37 = vld [vmem:[%s2767_s6 + $0xf0] sm:$0xff] }
  0xe3   : > { %2019 = vmatpush1.bf16.msra.mxu0 %v2018_v29  ;;  %1013 = vmatprep.mubr.f32.mxu0 %v390_v32  ;;  %v288_v29 = vld [vmem:[%s2767_s6 + $0x68] sm:$0xff]  ;;  %v322_v39 = vld [vmem:[%s2767_s6 + $0x178] sm:$0xff]  ;;  %v321_v40 = vld [vmem:[%s2767_s6 + $0x170] sm:$0xff] }
  0xe4   : > { %2021 = vmatprep.subr.bf16.mxu0 %v2020_v34  ;;  %840 = vmatprep.mubr.f32.mxu1 %v372_v0  ;;  %v388_v32 = vld [vmem:[%s2767_s6 + $0x388] sm:$0xff]  ;;  %v2925_v34 = vpack.c.bf16 %v654_v28, %v652_v27  ;;  %v362_v0 = vld [vmem:[%s2767_s6 + $0x2b8] sm:$0xff]  ;;  %v281_v28 = vld [vmem:[%s2767_s6 + $0x30] sm:$0xff] }
  0xe5   : > { %2136 = vmatprep.subr.bf16.mxu1 %v2904_v4  ;;  %841 = vmatmul.mubr.f32.gmra.mrb[24].mxu1 %v371_v14  ;;  %v394_v14 = vld [vmem:[%s2767_s6 + $0x3b8] sm:$0xff]  ;;  %v384_v27 = vld [vmem:[%s2767_s6 + $0x368] sm:$0xff] }
  0xe6   : > { %1014 = vmatmul.mubr.f32.gmra.mrb[28].mxu0 %v389_v50  ;;  %2152 = vmatpush1.bf16.msra.mxu1 %v2910_v15  ;;  %v655_v50 = vld [vmem:[#allocation5 + $0x7e0] sm:$0xff] }
  0xe7   : > { %2023 = vmatpush1.bf16.msra.mxu0 %v2022_v53  ;;  %1019 = vmatprep.mubr.f32.mxu0 %v398_v57  ;;  %v657_v53 = vld [vmem:[#allocation5 + $0x7f0] sm:$0xff] }
  0xe8   : > { %2025 = vmatprep.subr.bf16.mxu0 %v2024_v58  ;;  %846 = vmatprep.mubr.f32.mxu1 %v380_v16  ;;  %v2945_v57 = vpack.c.bf16 %v657_v53, %v655_v50  ;;  %v312_v58 = vld [vmem:[%s2767_s6 + $0x128] sm:$0xff]  ;;  %v351_v16 = vld [vmem:[%s2767_s6 + $0x260] sm:$0xff] }
  0xe9   : > { %2137 = vmatprep.subr.bf16.mxu1 %v2914_v18  ;;  %847 = vmatmul.mubr.f32.gmra.mrb[26].mxu1 %v379_v30  ;;  %v289_v30 = vld [vmem:[%s2767_s6 + $0x70] sm:$0xff]  ;;  %v676_v50 = vld [vmem:[#allocation7 + $0x88] sm:$0xff] }
  0xea   : > { %1020 = vmatmul.mubr.f32.gmra.mrb[30].mxu0 %v397_v9  ;;  %2153 = vmatpush1.bf16.msra.mxu1 %v2921_v31  ;;  %v327_v9 = vld [vmem:[%s2767_s6 + $0x1a0] sm:$0xff] }
  0xeb   : > { %2027 = vmatpush1.bf16.msra.mxu0 %v2026_v10  ;;  %1090 = vmatprep.mubr.f32.mxu0 %v280_v13  ;;  %v378_v10 = vld [vmem:[%s2767_s6 + $0x338] sm:$0xff]  ;;  %v343_v13 = vld [vmem:[%s2767_s6 + $0x220] sm:$0xff] }
  0xec   : > { %2029 = vmatprep.subr.bf16.mxu0 %v2785_v35  ;;  %v287_v35 = vld [vmem:[%s2767_s6 + $0x60] sm:$0xff]  ;;  %852 = vmatprep.mubr.f32.mxu1 %v388_v32  ;;  %v297_v32 = vld [vmem:[%s2767_s6 + $0xb0] sm:$0xff] }
  0xed   : > { %2138 = vmatprep.subr.bf16.mxu1 %v2925_v34  ;;  %853 = vmatmul.mubr.f32.gmra.mrb[28].mxu1 %v387_v44  ;;  %v329_v44 = vld [vmem:[%s2767_s6 + $0x1b0] sm:$0xff] }
  0xee   : > { %1091 = vmatmul.mubr.f32.vlgmr.msra.gmra.mrb[0].mxu0 %v279_v25  ;;  %2154 = vmatpush1.bf16.msra.mxu1 %v2933_v47  ;;  %v367_v25 = vld [vmem:[%s2767_s6 + $0x2e0] sm:$0xff] }
  0xef   : > { %2031 = vmatpush1.bf16.msra.mxu0 %v2791_v49  ;;  %1096 = vmatprep.mubr.f32.mxu0 %v288_v29  ;;  %v396_v49 = vld [vmem:[%s2767_s6 + $0x3c8] sm:$0xff]  ;;  %v290_v29 = vld [vmem:[%s2767_s6 + $0x78] sm:$0xff] }
  0xf0   : > { %2033 = vmatprep.subr.bf16.mxu0 %v2794_v51  ;;  %v295_v51 = vld [vmem:[%s2767_s6 + $0xa0] sm:$0xff]  ;;  %858 = vmatprep.mubr.f32.mxu1 %v396_v49  ;;  %v337_v49 = vld [vmem:[%s2767_s6 + $0x1f0] sm:$0xff] }
  0xf1   : > { %2139 = vmatprep.subr.bf16.mxu1 %v2937_v48  ;;  %859 = vmatmul.mubr.f32.gmra.mrb[30].mxu1 %v395_v56 }
  0xf2   : > { %1097 = vmatmul.mubr.f32.gmra.mrb[2].mxu0 %v287_v35  ;;  %2155 = vmatpush1.bf16.msra.mxu1 %v2945_v57  ;;  %v313_v35 = vld [vmem:[%s2767_s6 + $0x130] sm:$0xff] }
  0xf3   : > { %2035 = vmatpush1.bf16.msra.mxu0 %v2800_v1  ;;  %1102 = vmatprep.mubr.f32.mxu0 %v296_v41  ;;  %v346_v1 = vld [vmem:[%s2767_s6 + $0x238] sm:$0xff] }
  0xf4   : > { %2037 = vmatprep.subr.bf16.mxu0 %v2804_v3  ;;  %v303_v3 = vld [vmem:[%s2767_s6 + $0xe0] sm:$0xff]  ;;  %1299 = vmatprep.mubr.f32.mxu1 %v346_v1  ;;  %v330_v41 = vld [vmem:[%s2767_s6 + $0x1b8] sm:$0xff] }
  0xf5   : > { %1300 = vmatmul.mubr.f32.vlgmr.msra.gmra.mrb[32].mxu1 %v345_v59  ;;  %v678_v1 = vld [vmem:[#allocation7 + $0x98] sm:$0xff] }
  0xf6   : > { %1103 = vmatmul.mubr.f32.gmra.mrb[4].mxu0 %v295_v51  ;;  %1305 = vmatprep.mubr.f32.mxu1 %v354_v60  ;;  %v659_v51 = vld [vmem:[#allocation7] sm:$0xff]  ;;  %v662_v59 = vld [vmem:[#allocation7 + $0x18] sm:$0xff] }
  0xf7   : > { %2039 = vmatpush1.bf16.msra.mxu0 %v2810_v17  ;;  %1108 = vmatprep.mubr.f32.mxu0 %v304_v55  ;;  %v311_v17 = vld [vmem:[%s2767_s6 + $0x120] sm:$0xff]  ;;  %v660_v55 = vld [vmem:[#allocation7 + $0x8] sm:$0xff] }
  0xf8   : > { %2041 = vmatprep.subr.bf16.mxu0 %v2814_v19  ;;  %v320_v19 = vld [vmem:[%s2767_s6 + $0x168] sm:$0xff]  ;;  %v2094_v56 = vpack.c.bf16 %v660_v55, %v659_v51 }
  0xf9   : > { %1306 = vmatmul.mubr.f32.gmra.mrb[34].mxu1 %v353_v61 }
  0xfa   : > { %1109 = vmatmul.mubr.f32.gmra.mrb[6].mxu0 %v303_v3  ;;  %1311 = vmatprep.mubr.f32.mxu1 %v362_v0  ;;  %v663_v0 = vld [vmem:[#allocation7 + $0x20] sm:$0xff] }
  0xfb   : > { %2043 = vmatpush1.bf16.msra.mxu0 %v2820_v33  ;;  %1114 = vmatprep.mubr.f32.mxu0 %v312_v58  ;;  %v328_v33 = vld [vmem:[%s2767_s6 + $0x1a8] sm:$0xff]  ;;  %v661_v58 = vld [vmem:[#allocation7 + $0x10] sm:$0xff] }
  0xfc   : > { %2045 = vmatprep.subr.bf16.mxu0 %v2824_v36  ;;  %v361_v36 = vld [vmem:[%s2767_s6 + $0x2b0] sm:$0xff]  ;;  %v2098_v60 = vpack.c.bf16 %v662_v59, %v661_v58 }
  0xfd   : > { %1312 = vmatmul.mubr.f32.gmra.mrb[36].mxu1 %v361_v36  ;;  %v681_v36 = vld [vmem:[#allocation7 + $0xb0] sm:$0xff] }
  0xfe   : > { %1115 = vmatmul.mubr.f32.gmra.mrb[8].mxu0 %v311_v17  ;;  %1317 = vmatprep.mubr.f32.mxu1 %v370_v7  ;;  %v679_v17 = vld [vmem:[#allocation7 + $0xa0] sm:$0xff]  ;;  %v682_v7 = vld [vmem:[#allocation7 + $0xb8] sm:$0xff] }
  0xff   : > { %2047 = vmatpush1.bf16.msra.mxu0 %v2830_v52  ;;  %1120 = vmatprep.mubr.f32.mxu0 %v320_v19  ;;  %v336_v52 = vld [vmem:[%s2767_s6 + $0x1e8] sm:$0xff] }
 0x100   : > { %2049 = vmatprep.subr.bf16.mxu0 %v2834_v54  ;;  %v369_v54 = vld [vmem:[%s2767_s6 + $0x2f0] sm:$0xff]  ;;  %v680_v19 = vld [vmem:[#allocation7 + $0xa8] sm:$0xff] }
 0x101   : > { %1318 = vmatmul.mubr.f32.gmra.mrb[38].mxu1 %v369_v54  ;;  %v2100_v61 = vpack.c.bf16 %v680_v19, %v679_v17  ;;  %v666_v54 = vld [vmem:[#allocation7 + $0x38] sm:$0xff] }
 0x102   : > { %1121 = vmatmul.mubr.f32.gmra.mrb[10].mxu0 %v319_v5  ;;  %1323 = vmatprep.mubr.f32.mxu1 %v378_v10  ;;  %v664_v5 = vld [vmem:[#allocation7 + $0x28] sm:$0xff] }
 0x103   : > { %2051 = vmatpush1.bf16.msra.mxu0 %v2840_v6  ;;  %1126 = vmatprep.mubr.f32.mxu0 %v328_v33  ;;  %v344_v6 = vld [vmem:[%s2767_s6 + $0x228] sm:$0xff]  ;;  %v2102_v33 = vpack.c.bf16 %v664_v5, %v663_v0  ;;  %v694_v5 = vlaneseq }
 0x104   : > { %2053 = vmatprep.subr.bf16.mxu0 %v2844_v8  ;;  %v377_v8 = vld [vmem:[%s2767_s6 + $0x330] sm:$0xff] }
 0x105   : > { %1324 = vmatmul.mubr.f32.gmra.mrb[40].mxu1 %v377_v8 }
 0x106   : > { %1127 = vmatmul.mubr.f32.gmra.mrb[12].mxu0 %v327_v9  ;;  %1329 = vmatprep.mubr.f32.mxu1 %v386_v12  ;;  %v2104_v9 = vpack.c.bf16 %v682_v7, %v681_v36  ;;  %v667_v12 = vld [vmem:[#allocation7 + $0x40] sm:$0xff]  ;;  %v695_v7 = vshrl.u32 %v694_v5, 7 }
 0x107   : > { %2055 = vmatpush1.bf16.msra.mxu0 %v2850_v24  ;;  %1132 = vmatprep.mubr.f32.mxu0 %v336_v52  ;;  %v352_v24 = vld [vmem:[%s2767_s6 + $0x268] sm:$0xff]  ;;  %v665_v52 = vld [vmem:[#allocation7 + $0x30] sm:$0xff] }
 0x108   : > { %2057 = vmatprep.subr.bf16.mxu0 %v2854_v26  ;;  %v385_v26 = vld [vmem:[%s2767_s6 + $0x370] sm:$0xff]  ;;  %v2106_v10 = vpack.c.bf16 %v666_v54, %v665_v52  ;;  %v696_v54 = vsub.s32 0, %v695_v7 }
 0x109   : > { %1330 = vmatmul.mubr.f32.gmra.mrb[42].mxu1 %v385_v26  ;;  %v685_v26 = vld [vmem:[#allocation7 + $0xd0] sm:$0xff] }
 0x10a   : > { %1133 = vmatmul.mubr.f32.gmra.mrb[14].mxu0 %v335_v11  ;;  %1335 = vmatprep.mubr.f32.mxu1 %v394_v14  ;;  %v683_v11 = vld [vmem:[#allocation7 + $0xc0] sm:$0xff]  ;;  %v686_v14 = vld [vmem:[#allocation7 + $0xd8] sm:$0xff] }
 0x10b   : > { %2059 = vmatpush1.bf16.msra.mxu0 %v2860_v43  ;;  %1138 = vmatprep.mubr.f32.mxu0 %v344_v6  ;;  %v360_v43 = vld [vmem:[%s2767_s6 + $0x2a8] sm:$0xff] }
 0x10c   : > { %2061 = vmatprep.subr.bf16.mxu0 %v2864_v45  ;;  %v393_v45 = vld [vmem:[%s2767_s6 + $0x3b0] sm:$0xff]  ;;  %v684_v6 = vld [vmem:[#allocation7 + $0xc8] sm:$0xff] }
 0x10d   : > { %1336 = vmatmul.mubr.f32.gmra.mrb[44].mxu1 %v393_v45  ;;  %v2108_v8 = vpack.c.bf16 %v684_v6, %v683_v11  ;;  %v670_v45 = vld [vmem:[#allocation7 + $0x58] sm:$0xff]  ;;  %v700_v11 = vsub.s32 1, %v695_v7 }
 0x10e   : > { %1139 = vmatmul.mubr.f32.gmra.mrb[16].mxu0 %v343_v13  ;;  %1341 = vmatprep.mubr.f32.mxu1 %v402_v20  ;;  %v668_v13 = vld [vmem:[#allocation7 + $0x48] sm:$0xff] }
 0x10f   : > { %2063 = vmatpush1.bf16.msra.mxu0 %v2870_v63  ;;  %1144 = vmatprep.mubr.f32.mxu0 %v352_v24  ;;  %v368_v63 = vld [vmem:[%s2767_s6 + $0x2e8] sm:$0xff]  ;;  %v2110_v24 = vpack.c.bf16 %v668_v13, %v667_v12 }
 0x110   : > { %2065 = vmatprep.subr.bf16.mxu0 %v2874_v2  ;;  %v401_v2 = vld [vmem:[%s2767_s6 + $0x3f0] sm:$0xff] }
 0x111   : > { %1342 = vmatmul.mubr.f32.gmra.mrb[46].mxu1 %v401_v2 }
 0x112   : > { %1145 = vmatmul.mubr.f32.gmra.mrb[18].mxu0 %v351_v16  ;;  %v2112_v16 = vpack.c.bf16 %v686_v14, %v685_v26 }
 0x113   : > { %2067 = vmatpush1.bf16.msra.mxu0 %v2880_v21  ;;  %1150 = vmatprep.mubr.f32.mxu0 %v360_v43  ;;  %v376_v21 = vld [vmem:[%s2767_s6 + $0x328] sm:$0xff]  ;;  %v669_v43 = vld [vmem:[#allocation7 + $0x50] sm:$0xff] }
 0x114   : > { %2069 = vmatprep.subr.bf16.mxu0 %v2884_v23  ;;  %v375_v23 = vld [vmem:[%s2767_s6 + $0x320] sm:$0xff]  ;;  %v2114_v20 = vpack.c.bf16 %v670_v45, %v669_v43 }
 0x116   : > { %1151 = vmatmul.mubr.f32.gmra.mrb[20].mxu0 %v359_v22  ;;  %v687_v22 = vld [vmem:[#allocation7 + $0xe0] sm:$0xff] }
 0x117   : > { %2071 = vmatpush1.bf16.msra.mxu0 %v2890_v42  ;;  %1156 = vmatprep.mubr.f32.mxu0 %v368_v63  ;;  %v383_v42 = vld [vmem:[%s2767_s6 + $0x360] sm:$0xff]  ;;  %v688_v63 = vld [vmem:[#allocation7 + $0xe8] sm:$0xff] }
 0x118   : > { %2073 = vmatprep.subr.bf16.mxu0 %v2894_v46  ;;  %v392_v46 = vld [vmem:[%s2767_s6 + $0x3a8] sm:$0xff]  ;;  %v2116_v2 = vpack.c.bf16 %v688_v63, %v687_v22 }
 0x11a   : > { %1157 = vmatmul.mubr.f32.gmra.mrb[22].mxu0 %v367_v25  ;;  %v671_v25 = vld [vmem:[#allocation7 + $0x60] sm:$0xff] }
 0x11b   : > { %2075 = vmatpush1.bf16.msra.mxu0 %v2900_v62  ;;  %1162 = vmatprep.mubr.f32.mxu0 %v376_v21  ;;  %v391_v62 = vld [vmem:[%s2767_s6 + $0x3a0] sm:$0xff]  ;;  %v672_v21 = vld [vmem:[#allocation7 + $0x68] sm:$0xff] }
 0x11c   : > { %2077 = vmatprep.subr.bf16.mxu0 %v2904_v4  ;;  %v400_v4 = vld [vmem:[%s2767_s6 + $0x3e8] sm:$0xff] }
 0x11e   : > { %1163 = vmatmul.mubr.f32.gmra.mrb[24].mxu0 %v375_v23  ;;  %v2118_v23 = vpack.c.bf16 %v672_v21, %v671_v25 }
 0x11f   : > { %2079 = vmatpush1.bf16.msra.mxu0 %v2910_v15  ;;  %1168 = vmatprep.mubr.f32.mxu0 %v384_v27  ;;  %v399_v15 = vld [vmem:[%s2767_s6 + $0x3e0] sm:$0xff]  ;;  %v689_v27 = vld [vmem:[#allocation7 + $0xf0] sm:$0xff] }
 0x120   : > { %2081 = vmatprep.subr.bf16.mxu0 %v2914_v18  ;;  %v282_v18 = vld [vmem:[%s2767_s6 + $0x38] sm:$0xff] }
 0x122   : > { %1169 = vmatmul.mubr.f32.gmra.mrb[26].mxu0 %v383_v42  ;;  %v690_v42 = vld [vmem:[#allocation7 + $0xf8] sm:$0xff] }
 0x123   : > { %2083 = vmatpush1.bf16.msra.mxu0 %v2921_v31  ;;  %1174 = vmatprep.mubr.f32.mxu0 %v392_v46  ;;  %v298_v31 = vld [vmem:[%s2767_s6 + $0xb8] sm:$0xff]  ;;  %v2120_v46 = vpack.c.bf16 %v690_v42, %v689_v27 }
 0x124   : > { %2085 = vmatprep.subr.bf16.mxu0 %v2925_v34  ;;  %v306_v34 = vld [vmem:[%s2767_s6 + $0xf8] sm:$0xff] }
 0x126   : > { %1175 = vmatmul.mubr.f32.gmra.mrb[28].mxu0 %v391_v62  ;;  %v673_v62 = vld [vmem:[#allocation7 + $0x70] sm:$0xff] }
 0x127   : > { %2087 = vmatpush1.bf16.msra.mxu0 %v2933_v47  ;;  %1180 = vmatprep.mubr.f32.mxu0 %v400_v4  ;;  %v338_v47 = vld [vmem:[%s2767_s6 + $0x1f8] sm:$0xff]  ;;  %s2483_s6 = scalar_lea.vmem %s2482_s7, 4096 }
 0x128   : > { %2089 = vmatprep.subr.bf16.mxu0 %v2937_v48  ;;  %v675_v48 = vld [vmem:[#allocation7 + $0x80] sm:$0xff]  ;;  %v674_v4 = vld [vmem:[#allocation7 + $0x78] sm:$0xff]  ;;  %p2485_p9 = scmp.lt.s32.totalorder %s2483_s6, %s2477_s23 }
 0x129   : > { %v2092_v53 = vpack.c.bf16 %v676_v50, %v675_v48 }
 0x12a   : > { %1181 = vmatmul.mubr.f32.gmra.mrb[30].mxu0 %v399_v15  ;;  %v2122_v15 = vpack.c.bf16 %v674_v4, %v673_v62  ;;  %p2486_p12 = por %p2485_p9, %p2484_p5 }
 0x12b   : > { %2091 = vmatpush1.bf16.msra.mxu0 %v2945_v57  ;;  %1251 = vmatprep.mubr.f32.mxu0 %v282_v18  ;;  %v677_v57 = vld [vmem:[#allocation7 + $0x90] sm:$0xff] }
 0x12c   : > { %2093 = vmatprep.subr.bf16.mxu1 %v2092_v53  ;;  %v2096_v3 = vpack.c.bf16 %v678_v1, %v677_v57  ;;  %p2487_p2 = pnand %p2486_p12, %p2480_p3 }
 0x12d   : > { %2095 = vmatpush3.bf16.msra.mxu1 %v2094_v56 }
 0x12e   : > { %1252 = vmatmul.mubr.f32.vlgmr.msra.gmra.mrb[0].mxu0 %v281_v28  ;;  %2097 = vmatprep.subr.bf16.mxu1 %v2096_v3 }
 0x12f   : > { %1257 = vmatprep.mubr.f32.mxu0 %v290_v29 }
 0x131   : > { %2099 = vmatpush3.bf16.msra.mxu1 %v2098_v60 }
 0x132   : > { %1258 = vmatmul.mubr.f32.gmra.mrb[2].mxu0 %v289_v30  ;;  %2101 = vmatprep.subr.bf16.mxu1 %v2100_v61 }
 0x133   : > { %1263 = vmatprep.mubr.f32.mxu0 %v298_v31 }
 0x135   : > { %2103 = vmatpush3.bf16.msra.mxu1 %v2102_v33 }
 0x136   : > { %1264 = vmatmul.mubr.f32.gmra.mrb[4].mxu0 %v297_v32  ;;  %2105 = vmatprep.subr.bf16.mxu1 %v2104_v9 }
 0x137   : > { %1269 = vmatprep.mubr.f32.mxu0 %v306_v34 }
 0x139   : > { %2107 = vmatpush3.bf16.msra.mxu1 %v2106_v10  ;;  %v691_v10 = vld [vmem:[%s3359_s2] sm:$0x3] }
 0x13a   : > { %1270 = vmatmul.mubr.f32.gmra.mrb[6].mxu0 %v305_v37  ;;  %2109 = vmatprep.subr.bf16.mxu1 %v2108_v8  ;;  %v3080_v12 = vrot.slane %v691_v10, %v696_v54  ;;  %v3082_v13 = vrot.slane %v691_v10, %v700_v11 }
 0x13b   : > { %1275 = vmatprep.mubr.f32.mxu0 %v314_v38 }
 0x13d   : > { %2111 = vmatpush3.bf16.msra.mxu1 %v2110_v24 }
 0x13e   : > { %1276 = vmatmul.mubr.f32.gmra.mrb[8].mxu0 %v313_v35  ;;  %2113 = vmatprep.subr.bf16.mxu1 %v2112_v16 }
 0x13f   : > { %1281 = vmatprep.mubr.f32.mxu0 %v322_v39 }
 0x141   : > { %2115 = vmatpush3.bf16.msra.mxu1 %v2114_v20 }
 0x142   : > { %1282 = vmatmul.mubr.f32.gmra.mrb[10].mxu0 %v321_v40  ;;  %2117 = vmatprep.subr.bf16.mxu1 %v2116_v2 }
 0x143   : > { %1287 = vmatprep.mubr.f32.mxu0 %v330_v41 }
 0x145   : > { %2119 = vmatpush3.bf16.msra.mxu1 %v2118_v23 }
 0x146   : > { %1288 = vmatmul.mubr.f32.gmra.mrb[12].mxu0 %v329_v44  ;;  %2121 = vmatprep.subr.bf16.mxu1 %v2120_v46 }
 0x147   : > { %1293 = vmatprep.mubr.f32.mxu0 %v338_v47 }
 0x149   : > { %2123 = vmatpush3.bf16.msra.mxu1 %v2122_v15 }
 0x14a   : > { %1294 = vmatmul.mubr.f32.gmra.mrb[14].mxu0 %v337_v49 }
 0x188   : > { %v3033_v18 = vpop.f32.mrb[0].mxu1 }
 0x189   : > { %v3035_v28 = vpop.f32.mrb[1].mxu1 }
 0x18c   : > { %v3037_v29 = vpop.f32.mrb[2].mxu1 }
 0x18d   : > { %v3039_v30 = vpop.f32.mrb[3].mxu1 }
 0x190   : > { %v3041_v31 = vpop.f32.mrb[4].mxu1 }
 0x191   : > { %v3043_v32 = vpop.f32.mrb[5].mxu1 }
 0x194   : > { %v3045_v34 = vpop.f32.mrb[6].mxu1 }
 0x195   : > { %v3047_v37 = vpop.f32.mrb[7].mxu1 }
 0x198   : > { %v3049_v38 = vpop.f32.mrb[8].mxu1 }
 0x199   : > { %v3051_v35 = vpop.f32.mrb[9].mxu1 }
 0x19c   : > { %v3053_v39 = vpop.f32.mrb[10].mxu1 }
 0x19d   : > { %v3055_v40 = vpop.f32.mrb[11].mxu1 }
 0x1a0   : > { %v3057_v41 = vpop.f32.mrb[12].mxu1 }
 0x1a1   : > { %v3059_v44 = vpop.f32.mrb[13].mxu1 }
 0x1a4   : > { %v3061_v47 = vpop.f32.mrb[14].mxu1 }
 0x1a5   : > { %v3063_v49 = vpop.f32.mrb[15].mxu1 }
 0x1a8   : > { %v818_v48 = vpop.f32.mrb[16].mxu1 }
 0x1a9   : > { %v820_v50 = vpop.f32.mrb[17].mxu1  ;;  %v819_v14 = vadd.f32 %v818_v48, %v3080_v12 }
 0x1aa   : > { %v821_v16 = vadd.f32 %v820_v50, %v3082_v13 }
 0x1ac   : > { %v824_v53 = vpop.f32.mrb[18].mxu1 }
 0x1ad   : > { %v826_v51 = vpop.f32.mrb[19].mxu1  ;;  %v825_v22 = vadd.f32 %v824_v53, %v3080_v12 }
 0x1ae   : > { %v827_v25 = vadd.f32 %v826_v51, %v3082_v13 }
 0x1b0   : > { %v830_v55 = vpop.f32.mrb[20].mxu1 }
 0x1b1   : > { %v832_v56 = vpop.f32.mrb[21].mxu1  ;;  %v831_v4 = vadd.f32 %v830_v55, %v3080_v12 }
 0x1b2   : > { %v833_v50 = vadd.f32 %v832_v56, %v3082_v13 }
 0x1b4   : > { %v836_v57 = vpop.f32.mrb[22].mxu1 }
 0x1b5   : > { %v838_v1 = vpop.f32.mrb[23].mxu1 }
 0x1b8   : > { %v842_v3 = vpop.f32.mrb[24].mxu1 }
 0x1b9   : > { %v844_v58 = vpop.f32.mrb[25].mxu1 }
 0x1bc   : > { %v3065_v59 = vpop.f32.mrb[26].mxu1 }
 0x1bd   : > { %v3067_v60 = vpop.f32.mrb[27].mxu1 }
 0x1c0   : > { %v3069_v17 = vpop.f32.mrb[28].mxu1 }
 0x1c1   : > { %v3071_v19 = vpop.f32.mrb[29].mxu1 }
 0x1c4   : > { %v3073_v61 = vpop.f32.mrb[30].mxu1 }
 0x1c5   : > { %v3075_v0 = vpop.f32.mrb[31].mxu1 }
 0x1c8   : > { %v1301_v33 = vpop.f32.mrb[32].mxu1 }
 0x1c9   : > { %v1303_v36 = vpop.f32.mrb[33].mxu1 }
 0x1cc   : > { %v1307_v9 = vpop.f32.mrb[34].mxu1 }
 0x1cd   : > { %v1309_v52 = vpop.f32.mrb[35].mxu1 }
 0x1d0   : > { %v1313_v6 = vpop.f32.mrb[36].mxu1 }
 0x1d1   : > { %v1315_v8 = vpop.f32.mrb[37].mxu1 }
 0x1d4   : > { %v1319_v24 = vpop.f32.mrb[38].mxu1 }
 0x1d5   : > { %v1321_v26 = vpop.f32.mrb[39].mxu1 }
 0x1d8   : > { %v1325_v43 = vpop.f32.mrb[40].mxu1 }
 0x1d9   : > { %v1327_v45 = vpop.f32.mrb[41].mxu1 }
 0x1dc   : > { %v1331_v23 = vpop.f32.mrb[42].mxu1 }
 0x1dd   : > { %v1333_v42 = vpop.f32.mrb[43].mxu1 }
 0x1e0   : > { %v1337_v53 = vpop.f32.mrb[44].mxu1 }
 0x1e1   : > { %v1140_v20 = vpop.f32.mrb[16].mxu0  ;;  %v1339_v54 = vpop.f32.mrb[45].mxu1 }
 0x1e2   : > { %v2189_v63 = vadd.f32 %v1140_v20, %v819_v14  ;;  %v1142_v2 = vpop.f32.mrb[17].mxu0  ;;  %v839_v14 = vadd.f32 %v838_v1, %v3082_v13 }
 0x1e3   : > { %v2192_v21 = vadd.f32 %v1142_v2, %v821_v16 }
 0x1e4   : > { %v3088_v27 = vadd.f32 %v2189_v63, %v1301_v33  ;;  %v837_v33 = vadd.f32 %v836_v57, %v3080_v12  ;;  %v1343_v55 = vpop.f32.mrb[46].mxu1 }
 0x1e5   : > { %v3090_v46 = vadd.f32 %v2192_v21, %v1303_v36  ;;  %v1146_v62 = vpop.f32.mrb[18].mxu0 }
 0x1e6   : > { %v2195_v15 = vadd.f32 %v1146_v62, %v825_v22  ;;  %v1148_v48 = vpop.f32.mrb[19].mxu0  ;;  %v1345_v22 = vpop.f32.mrb[47].mxu1 }
 0x1e7   : > { %v2198_v5 = vadd.f32 %v1148_v48, %v827_v25  ;;  %v845_v25 = vadd.f32 %v844_v58, %v3082_v13 }
 0x1e8   : > { %v3094_v7 = vadd.f32 %v2195_v15, %v1307_v9  ;;  %v843_v9 = vadd.f32 %v842_v3, %v3080_v12 }
 0x1e9   : > { %v3096_v51 = vadd.f32 %v2198_v5, %v1309_v52  ;;  %v1152_v10 = vpop.f32.mrb[20].mxu0 }
 0x1ea   : > { %v2201_v11 = vadd.f32 %v1152_v10, %v831_v4  ;;  %v1154_v36 = vpop.f32.mrb[21].mxu0  ;;  %v857_v10 = vadd.f32 %v3071_v19, %v3082_v13 }
 0x1eb   : > { %v2204_v16 = vadd.f32 %v1154_v36, %v833_v50 }
 0x1ec   : > { %v3100_v20 = vadd.f32 %v2201_v11, %v1313_v6  ;;  %v849_v6 = vadd.f32 %v3065_v59, %v3080_v12 }
 0x1ed   : > { %v3102_v56 = vadd.f32 %v2204_v16, %v1315_v8  ;;  %v1158_v63 = vpop.f32.mrb[22].mxu0  ;;  %v851_v8 = vadd.f32 %v3067_v60, %v3082_v13 }
 0x1ee   : > { %v2207_v2 = vadd.f32 %v1158_v63, %v837_v33  ;;  %v1160_v52 = vpop.f32.mrb[23].mxu0 }
 0x1ef   : > { %v2210_v21 = vadd.f32 %v1160_v52, %v839_v14  ;;  %v863_v14 = vadd.f32 %v3075_v0, %v3082_v13 }
 0x1f0   : > { %v3106_v57 = vadd.f32 %v2207_v2, %v1319_v24  ;;  %v855_v24 = vadd.f32 %v3069_v17, %v3080_v12 }
 0x1f1   : > { %v3108_v62 = vadd.f32 %v2210_v21, %v1321_v26  ;;  %v1164_v1 = vpop.f32.mrb[24].mxu0 }
 0x1f2   : > { %v2213_v4 = vadd.f32 %v1164_v1, %v843_v9  ;;  %v1166_v15 = vpop.f32.mrb[25].mxu0 }
 0x1f3   : > { %v2216_v48 = vadd.f32 %v1166_v15, %v845_v25 }
 0x1f4   : > { %v3114_v3 = vadd.f32 %v2213_v4, %v1325_v43  ;;  %v861_v43 = vadd.f32 %v3073_v61, %v3080_v12  ;;  %v773_v61 = vadd.f32 %v3035_v28, %v3082_v13  ;;  %v783_v28 = vadd.f32 %v3041_v31, %v3080_v12 }
 0x1f5   : > { %v3116_v50 = vadd.f32 %v2216_v48, %v1327_v45  ;;  %v1170_v58 = vpop.f32.mrb[26].mxu0 }
 0x1f6   : > { %v2219_v26 = vadd.f32 %v1170_v58, %v849_v6  ;;  %v1172_v5 = vpop.f32.mrb[27].mxu0  ;;  %v779_v6 = vadd.f32 %v3039_v30, %v3082_v13 }
 0x1f7   : > { %v2222_v59 = vadd.f32 %v1172_v5, %v851_v8 }
 0x1f8   : > { %v3122_v33 = vadd.f32 %v2219_v26, %v1331_v23 }
 0x1f9   : > { %v3124_v11 = vadd.f32 %v2222_v59, %v1333_v42  ;;  %v1176_v60 = vpop.f32.mrb[28].mxu0  ;;  %v771_v42 = vadd.f32 %v3033_v18, %v3080_v12  ;;  %v791_v59 = vadd.f32 %v3047_v37, %v3082_v13 }
 0x1fa   : > { %v2225_v45 = vadd.f32 %v1176_v60, %v855_v24  ;;  %v1178_v36 = vpop.f32.mrb[29].mxu0 }
 0x1fb   : > { %v2228_v17 = vadd.f32 %v1178_v36, %v857_v10  ;;  %v789_v10 = vadd.f32 %v3045_v34, %v3080_v12 }
 0x1fc   : > { %v3130_v16 = vadd.f32 %v2225_v45, %v1337_v53 }
 0x1fd   : > { %v3132_v63 = vadd.f32 %v2228_v17, %v1339_v54  ;;  %v1182_v19 = vpop.f32.mrb[30].mxu0  ;;  %v777_v54 = vadd.f32 %v3037_v29, %v3080_v12  ;;  %v797_v17 = vadd.f32 %v3051_v35, %v3082_v13 }
 0x1fe   : > { %v2231_v9 = vadd.f32 %v1182_v19, %v861_v43  ;;  %v1184_v23 = vpop.f32.mrb[31].mxu0 }
 0x1ff   : > { %v2234_v2 = vadd.f32 %v1184_v23, %v863_v14  ;;  %v795_v14 = vadd.f32 %v3049_v38, %v3080_v12 }
 0x200   : > { %v3136_v52 = vadd.f32 %v2231_v9, %v1343_v55 }
 0x201   : > { %v3140_v25 = vadd.f32 %v2234_v2, %v1345_v22  ;;  %v1253_v0 = vpop.f32.mrb[0].mxu0  ;;  %v785_v22 = vadd.f32 %v3043_v32, %v3082_v13 }
 0x202   : > { %v2157_v21 = vadd.f32 %v1253_v0, %v771_v42  ;;  %v1255_v53 = vpop.f32.mrb[1].mxu0  ;;  %v801_v42 = vadd.f32 %v3053_v39, %v3080_v12 }
 0x203   : > { %v2159_v1 = vadd.f32 %v1255_v53, %v773_v61  ;;  %v803_v61 = vadd.f32 %v3055_v40, %v3082_v13 }
 0x204   : > { %v1348_v18 = vmax.f32 %v2157_v21, 0.0 }
 0x205   : > { %v1349_v4 = vmax.f32 %v2159_v1, 0.0  ;;  %v1259_v15 = vpop.f32.mrb[2].mxu0 }
 0x206   : > { %v2161_v55 = vadd.f32 %v1259_v15, %v777_v54  ;;  %v1261_v8 = vpop.f32.mrb[3].mxu0  ;;  %v807_v54 = vadd.f32 %v3057_v41, %v3080_v12 }
 0x207   : > { %v2163_v48 = vadd.f32 %v1261_v8, %v779_v6  ;;  %1450 = vmatprep.mubr.f32.mxu1 %v1349_v4  ;;  %v809_v6 = vadd.f32 %v3059_v44, %v3082_v13  ;;  %v813_v8 = vadd.f32 %v3061_v47, %v3080_v12  ;;  %v1364_v47 = vmax.f32 %v3088_v27, 0.0 }
 0x208   : > { %1451 = vmatmul.mubr.f32.vlgmr.msra.gmra.mrb[48].mxu1 %v1348_v18  ;;  %v1350_v29 = vmax.f32 %v2161_v55, 0.0  ;;  %v1367_v12 = vmax.f32 %v3096_v51, 0.0  ;;  %v1373_v27 = vmax.f32 %v3116_v50, 0.0  ;;  %v1372_v51 = vmax.f32 %v3114_v3, 0.0 }
 0x209   : > { %v1351_v58 = vmax.f32 %v2163_v48, 0.0  ;;  %v1265_v24 = vpop.f32.mrb[4].mxu0  ;;  %v815_v48 = vadd.f32 %v3063_v49, %v3082_v13  ;;  %v1366_v49 = vmax.f32 %v3094_v7, 0.0  ;;  %v1369_v13 = vmax.f32 %v3102_v56, 0.0 }
 0x20a   : > { %v2165_v26 = vadd.f32 %v1265_v24, %v783_v28  ;;  %v1267_v5 = vpop.f32.mrb[5].mxu0  ;;  %v1375_v7 = vmax.f32 %v3124_v11, 0.0  ;;  %v1374_v56 = vmax.f32 %v3122_v33, 0.0  ;;  %v1378_v50 = vmax.f32 %v3136_v52, 0.0  ;;  %v3189_v11 = vld [vmem:[%s3361_s4] ss:$0 sm:$0xff] }
 0x20b   : > { %v2167_v30 = vadd.f32 %v1267_v5, %v785_v22  ;;  %1455 = vmatprep.mubr.f32.mxu1 %v1351_v58  ;;  %v1365_v5 = vmax.f32 %v3090_v46, 0.0  ;;  %v1370_v46 = vmax.f32 %v3106_v57, 0.0  ;;  %v1379_v57 = vmax.f32 %v3140_v25, 0.0 }
 0x20c   : > { %1456 = vmatmul.mubr.f32.gmra.mrb[50].mxu1 %v1350_v29  ;;  %v1352_v43 = vmax.f32 %v2165_v26, 0.0 }
 0x20d   : > { %v1353_v60 = vmax.f32 %v2167_v30, 0.0  ;;  %v1271_v31 = vpop.f32.mrb[6].mxu0  ;;  %v1368_v30 = vmax.f32 %v3100_v20, 0.0  ;;  %v1377_v20 = vmax.f32 %v3132_v63, 0.0 }
 0x20e   : > { %v2169_v45 = vadd.f32 %v1271_v31, %v789_v10  ;;  %v1273_v36 = vpop.f32.mrb[7].mxu0  ;;  %v1371_v10 = vmax.f32 %v3108_v62, 0.0  ;;  %v1376_v62 = vmax.f32 %v3130_v16, 0.0 }
 0x20f   : > { %v2171_v32 = vadd.f32 %v1273_v36, %v791_v59  ;;  %1460 = vmatprep.mubr.f32.mxu1 %v1353_v60 }
 0x210   : > { %1461 = vmatmul.mubr.f32.gmra.mrb[52].mxu1 %v1352_v43  ;;  %v1354_v9 = vmax.f32 %v2169_v45, 0.0 }
 0x211   : > { %v1355_v19 = vmax.f32 %v2171_v32, 0.0  ;;  %v1277_v34 = vpop.f32.mrb[8].mxu0 }
 0x212   : > { %v2173_v23 = vadd.f32 %v1277_v34, %v795_v14  ;;  %v1279_v2 = vpop.f32.mrb[9].mxu0 }
 0x213   : > { %v2175_v37 = vadd.f32 %v1279_v2, %v797_v17  ;;  %1465 = vmatprep.mubr.f32.mxu1 %v1355_v19 }
 0x214   : > { %1466 = vmatmul.mubr.f32.gmra.mrb[54].mxu1 %v1354_v9  ;;  %v1356_v21 = vmax.f32 %v2173_v23, 0.0 }
 0x215   : > { %v1357_v0 = vmax.f32 %v2175_v37, 0.0  ;;  %v1283_v38 = vpop.f32.mrb[10].mxu0 }
 0x216   : > { %v2177_v53 = vadd.f32 %v1283_v38, %v801_v42  ;;  %v1285_v1 = vpop.f32.mrb[11].mxu0 }
 0x217   : > { %v2179_v35 = vadd.f32 %v1285_v1, %v803_v61  ;;  %1470 = vmatprep.mubr.f32.mxu1 %v1357_v0 }
 0x218   : > { %1471 = vmatmul.mubr.f32.gmra.mrb[56].mxu1 %v1356_v21  ;;  %v1358_v15 = vmax.f32 %v2177_v53, 0.0 }
 0x219   : > { %v1359_v4 = vmax.f32 %v2179_v35, 0.0  ;;  %v1289_v39 = vpop.f32.mrb[12].mxu0 }
 0x21a   : > { %v2181_v18 = vadd.f32 %v1289_v39, %v807_v54  ;;  %v1291_v55 = vpop.f32.mrb[13].mxu0 }
 0x21b   : > { %v2183_v40 = vadd.f32 %v1291_v55, %v809_v6  ;;  %1475 = vmatprep.mubr.f32.mxu1 %v1359_v4 }
 0x21c   : > { %1476 = vmatmul.mubr.f32.gmra.mrb[58].mxu1 %v1358_v15  ;;  %v1360_v22 = vmax.f32 %v2181_v18, 0.0 }
 0x21d   : > { %v1361_v28 = vmax.f32 %v2183_v40, 0.0  ;;  %v1295_v41 = vpop.f32.mrb[14].mxu0 }
 0x21e   : > { %v2185_v58 = vadd.f32 %v1295_v41, %v813_v8  ;;  %v1297_v24 = vpop.f32.mrb[15].mxu0 }
 0x21f   : > { %v2187_v44 = vadd.f32 %v1297_v24, %v815_v48  ;;  %1480 = vmatprep.mubr.f32.mxu1 %v1361_v28 }
 0x220   : > { %1481 = vmatmul.mubr.f32.gmra.mrb[60].mxu1 %v1360_v22  ;;  %v1362_v26 = vmax.f32 %v2185_v58, 0.0 }
 0x221   : > { %v1363_v29 = vmax.f32 %v2187_v44, 0.0 }
 0x223   : > { %1485 = vmatprep.mubr.f32.mxu1 %v1363_v29 }
 0x224   : > { %1486 = vmatmul.mubr.f32.gmra.mrb[62].mxu1 %v1362_v26 }
 0x225   : > { %1490 = vmatprep.mubr.f32.mxu1 %v1365_v5 }
 0x228   : > { %1491 = vmatmul.mubr.f32.gmra.mrb[64].mxu1 %v1364_v47 }
 0x229   : > { %1495 = vmatprep.mubr.f32.mxu1 %v1367_v12 }
 0x22c   : > { %1496 = vmatmul.mubr.f32.gmra.mrb[66].mxu1 %v1366_v49 }
 0x22d   : > { %1500 = vmatprep.mubr.f32.mxu1 %v1369_v13 }
 0x230   : > { %1501 = vmatmul.mubr.f32.gmra.mrb[68].mxu1 %v1368_v30 }
 0x231   : > { %1505 = vmatprep.mubr.f32.mxu1 %v1371_v10 }
 0x234   : > { %1506 = vmatmul.mubr.f32.gmra.mrb[70].mxu1 %v1370_v46 }
 0x235   : > { %1510 = vmatprep.mubr.f32.mxu1 %v1373_v27 }
 0x238   : > { %1511 = vmatmul.mubr.f32.gmra.mrb[72].mxu1 %v1372_v51 }
 0x239   : > { %1515 = vmatprep.mubr.f32.mxu1 %v1375_v7 }
 0x23c   : > { %1516 = vmatmul.mubr.f32.gmra.mrb[74].mxu1 %v1374_v56 }
 0x23d   : > { %1520 = vmatprep.mubr.f32.mxu1 %v1377_v20 }
 0x240   : > { %1521 = vmatmul.mubr.f32.gmra.mrb[76].mxu1 %v1376_v62 }
 0x241   : > { %1525 = vmatprep.mubr.f32.mxu1 %v1379_v57 }
 0x244   : > { %1526 = vmatmul.mubr.f32.gmra.mrb[78].mxu1 %v1378_v50 }
 0x2db   : > { %v1788_v3 = vpop.f32.mrb[48].mxu1 }
 0x2dc   : > { %v1789_v59 = vpop.f32.mrb[49].mxu1 }
 0x2dd   : > { %v1790_v33 = vadd.f32 %v1789_v59, %v1788_v3 }
 0x2df   : > { %v1791_v63 = vpop.f32.mrb[50].mxu1  ;;  %v3192_v60 = vadd.f32 %v1790_v33, %v3189_v11 }
 0x2e0   : > { %v1792_v16 = vpop.f32.mrb[51].mxu1 }
 0x2e1   : > { %v1793_v31 = vadd.f32 %v1792_v16, %v1791_v63  ;;  %v1531_v25 = vmul.f32 %v3192_v60, %v3192_v60 }
 0x2e3   : > { %v3197_v52 = vadd.f32 %v1793_v31, %v3189_v11  ;;  %v1794_v43 = vpop.f32.mrb[52].mxu1  ;;  %1547 = vadd.xlane.f32.xlu0 %v1531_v25 }
 0x2e4   : > { %v1795_v45 = vpop.f32.mrb[53].mxu1 }
 0x2e5   : > { %v1796_v36 = vadd.f32 %v1795_v45, %v1794_v43  ;;  %v1532_v32 = vmul.f32 %v3197_v52, %v3197_v52 }
 0x2e7   : > { %v1797_v14 = vpop.f32.mrb[54].mxu1  ;;  %1549 = vadd.xlane.f32.xlu0 %v1532_v32  ;;  %v3202_v17 = vadd.f32 %v1796_v36, %v3189_v11 }
 0x2e8   : > { %v1798_v19 = vpop.f32.mrb[55].mxu1 }
 0x2e9   : > { %v1799_v34 = vadd.f32 %v1798_v19, %v1797_v14  ;;  %v1533_v9 = vmul.f32 %v3202_v17, %v3202_v17 }
 0x2eb   : > { %v3207_v23 = vadd.f32 %v1799_v34, %v3189_v11  ;;  %v1800_v2 = vpop.f32.mrb[56].mxu1  ;;  %1551 = vadd.xlane.f32.xlu1 %v1533_v9 }
 0x2ec   : > { %v1801_v37 = vpop.f32.mrb[57].mxu1 }
 0x2ed   : > { %v1802_v42 = vadd.f32 %v1801_v37, %v1800_v2  ;;  %v1534_v61 = vmul.f32 %v3207_v23, %v3207_v23 }
 0x2ef   : > { %v3212_v0 = vadd.f32 %v1802_v42, %v3189_v11  ;;  %v1803_v38 = vpop.f32.mrb[58].mxu1  ;;  %1553 = vadd.xlane.f32.xlu1 %v1534_v61 }
 0x2f0   : > { %v1804_v21 = vpop.f32.mrb[59].mxu1 }
 0x2f1   : > { %v1805_v53 = vadd.f32 %v1804_v21, %v1803_v38  ;;  %v1535_v1 = vmul.f32 %v3212_v0, %v3212_v0 }
 0x2f3   : > { %v3217_v35 = vadd.f32 %v1805_v53, %v3189_v11  ;;  %v1806_v54 = vpop.f32.mrb[60].mxu1  ;;  %1555 = vadd.xlane.f32.xlu0 %v1535_v1 }
 0x2f4   : > { %v1807_v6 = vpop.f32.mrb[61].mxu1 }
 0x2f5   : > { %v1808_v4 = vadd.f32 %v1807_v6, %v1806_v54  ;;  %v1536_v39 = vmul.f32 %v3217_v35, %v3217_v35 }
 0x2f7   : > { %v3222_v15 = vadd.f32 %v1808_v4, %v3189_v11  ;;  %v1809_v18 = vpop.f32.mrb[62].mxu1  ;;  %1557 = vadd.xlane.f32.xlu1 %v1536_v39 }
 0x2f8   : > { %v1810_v55 = vpop.f32.mrb[63].mxu1 }
 0x2f9   : > { %v1811_v40 = vadd.f32 %v1810_v55, %v1809_v18  ;;  %v1537_v8 = vmul.f32 %v3222_v15, %v3222_v15 }
 0x2fb   : > { %v3227_v48 = vadd.f32 %v1811_v40, %v3189_v11  ;;  %v1812_v28 = vpop.f32.mrb[64].mxu1  ;;  %1559 = vadd.xlane.f32.xlu0 %v1537_v8 }
 0x2fc   : > { %v1813_v41 = vpop.f32.mrb[65].mxu1 }
 0x2fd   : > { %v1814_v22 = vadd.f32 %v1813_v41, %v1812_v28  ;;  %v1538_v58 = vmul.f32 %v3227_v48, %v3227_v48 }
 0x2ff   : > { %v3232_v24 = vadd.f32 %v1814_v22, %v3189_v11  ;;  %v1815_v44 = vpop.f32.mrb[66].mxu1  ;;  %1561 = vadd.xlane.f32.xlu1 %v1538_v58 }
 0x300   : > { %v1816_v29 = vpop.f32.mrb[67].mxu1 }
 0x301   : > { %v1817_v26 = vadd.f32 %v1816_v29, %v1815_v44  ;;  %v1539_v5 = vmul.f32 %v3232_v24, %v3232_v24 }
 0x303   : > { %v3237_v47 = vadd.f32 %v1817_v26, %v3189_v11  ;;  %v1818_v12 = vpop.f32.mrb[68].mxu1  ;;  %1563 = vadd.xlane.f32.xlu0 %v1539_v5 }
 0x304   : > { %v1819_v49 = vpop.f32.mrb[69].mxu1 }
 0x305   : > { %v1820_v13 = vadd.f32 %v1819_v49, %v1818_v12  ;;  %v1540_v30 = vmul.f32 %v3237_v47, %v3237_v47 }
 0x307   : > { %v3242_v10 = vadd.f32 %v1820_v13, %v3189_v11  ;;  %v1821_v46 = vpop.f32.mrb[70].mxu1  ;;  %1565 = vadd.xlane.f32.xlu1 %v1540_v30 }
 0x308   : > { %v1822_v27 = vpop.f32.mrb[71].mxu1 }
 0x309   : > { %v1823_v51 = vadd.f32 %v1822_v27, %v1821_v46  ;;  %v1541_v7 = vmul.f32 %v3242_v10, %v3242_v10 }
 0x30b   : > { %v3247_v56 = vadd.f32 %v1823_v51, %v3189_v11  ;;  %v1824_v20 = vpop.f32.mrb[72].mxu1  ;;  %1567 = vadd.xlane.f32.xlu0 %v1541_v7 }
 0x30c   : > { %v1825_v62 = vpop.f32.mrb[73].mxu1 }
 0x30d   : > { %v1826_v57 = vadd.f32 %v1825_v62, %v1824_v20  ;;  %v1542_v50 = vmul.f32 %v3247_v56, %v3247_v56 }
 0x30f   : > { %v3252_v3 = vadd.f32 %v1826_v57, %v3189_v11  ;;  %v1827_v59 = vpop.f32.mrb[74].mxu1  ;;  %1569 = vadd.xlane.f32.xlu1 %v1542_v50 }
 0x310   : > { %v1828_v33 = vpop.f32.mrb[75].mxu1 }
 0x311   : > { %v1829_v63 = vadd.f32 %v1828_v33, %v1827_v59  ;;  %v1543_v16 = vmul.f32 %v3252_v3, %v3252_v3 }
 0x313   : > { %v3257_v31 = vadd.f32 %v1829_v63, %v3189_v11  ;;  %v1830_v25 = vpop.f32.mrb[76].mxu1  ;;  %1571 = vadd.xlane.f32.xlu0 %v1543_v16 }
 0x314   : > { %v1831_v43 = vpop.f32.mrb[77].mxu1 }
 0x315   : > { %v1832_v45 = vadd.f32 %v1831_v43, %v1830_v25  ;;  %v1544_v36 = vmul.f32 %v3257_v31, %v3257_v31 }
 0x317   : > { %v3262_v32 = vadd.f32 %v1832_v45, %v3189_v11  ;;  %v1833_v14 = vpop.f32.mrb[78].mxu1  ;;  %1573 = vadd.xlane.f32.xlu1 %v1544_v36 }
 0x318   : > { %v1834_v19 = vpop.f32.mrb[79].mxu1 }
 0x319   : > { %v1835_v34 = vadd.f32 %v1834_v19, %v1833_v14  ;;  %v1545_v9 = vmul.f32 %v3262_v32, %v3262_v32 }
 0x31b   : > { %v3267_v2 = vadd.f32 %v1835_v34, %v3189_v11  ;;  %1575 = vadd.xlane.f32.xlu0 %v1545_v9 }
 0x31d   : > { %v1546_v37 = vmul.f32 %v3267_v2, %v3267_v2 }
 0x31f   : > { %1577 = vadd.xlane.f32.xlu1 %v1546_v37 }
 0x370   : > { %v1548_v42 = vpop.xlane.xlu0 %1547 }
 0x371   : > { %2359 = vrsqrt.f32 %v1548_v42 }
 0x374   : > { %v1550_v61 = vpop.xlane.xlu0 %1549 }
 0x375   : > { %2361 = vrsqrt.f32 %v1550_v61 }
 0x378   : > { %v1552_v38 = vpop.xlane.xlu1 %1551 }
 0x379   : > { %2363 = vrsqrt.f32 %v1552_v38 }
 0x37b   : > { %v2360_v21 = vpop.eup %2359 }
 0x37c   : > { %v1595_v53 = vmul.f32 %v2360_v21, %v3192_v60  ;;  %v1554_v1 = vpop.xlane.xlu1 %1553 }
 0x37d   : > { %2365 = vrsqrt.f32 %v1554_v1 }
 0x37e   : > { %1611 = vst [vmem:[%s3273_s13] sm:$0xff] %v1595_v53 }
 0x37f   : > { %v2362_v11 = vpop.eup %2361 }
 0x380   : > { %v1596_v54 = vmul.f32 %v2362_v11, %v3197_v52  ;;  %v1556_v6 = vpop.xlane.xlu0 %1555 }
 0x381   : > { %2367 = vrsqrt.f32 %v1556_v6 }
 0x382   : > { %1612 = vst [vmem:[%s3273_s13 + $0x8] sm:$0xff] %v1596_v54 }
 0x383   : > { %v2364_v4 = vpop.eup %2363 }
 0x384   : > { %v1597_v39 = vmul.f32 %v2364_v4, %v3202_v17  ;;  %v1558_v60 = vpop.xlane.xlu1 %1557 }
 0x385   : > { %2369 = vrsqrt.f32 %v1558_v60 }
 0x386   : > { %1613 = vst [vmem:[%s3273_s13 + $0x10] sm:$0xff] %v1597_v39 }
 0x387   : > { %v2366_v18 = vpop.eup %2365 }
 0x388   : > { %v1598_v55 = vmul.f32 %v2366_v18, %v3207_v23  ;;  %v1560_v40 = vpop.xlane.xlu0 %1559 }
 0x389   : > { %2371 = vrsqrt.f32 %v1560_v40 }
 0x38a   : > { %1614 = vst [vmem:[%s3273_s13 + $0x18] sm:$0xff] %v1598_v55 }
 0x38b   : > { %v2368_v8 = vpop.eup %2367 }
 0x38c   : > { %v1599_v52 = vmul.f32 %v2368_v8, %v3212_v0  ;;  %v1562_v28 = vpop.xlane.xlu1 %1561 }
 0x38d   : > { %2373 = vrsqrt.f32 %v1562_v28 }
 0x38e   : > { %1615 = vst [vmem:[%s3273_s13 + $0x20] sm:$0xff] %v1599_v52 }
 0x38f   : > { %v2370_v41 = vpop.eup %2369 }
 0x390   : > { %v1600_v17 = vmul.f32 %v2370_v41, %v3217_v35  ;;  %v1564_v22 = vpop.xlane.xlu0 %1563 }
 0x391   : > { %2375 = vrsqrt.f32 %v1564_v22 }
 0x392   : > { %1616 = vst [vmem:[%s3273_s13 + $0x28] sm:$0xff] %v1600_v17 }
 0x393   : > { %v2372_v58 = vpop.eup %2371 }
 0x394   : > { %v1601_v23 = vmul.f32 %v2372_v58, %v3222_v15  ;;  %v1566_v44 = vpop.xlane.xlu1 %1565 }
 0x395   : > { %2377 = vrsqrt.f32 %v1566_v44 }
 0x396   : > { %1617 = vst [vmem:[%s3273_s13 + $0x30] sm:$0xff] %v1601_v23 }
 0x397   : > { %v2374_v29 = vpop.eup %2373 }
 0x398   : > { %v1602_v0 = vmul.f32 %v2374_v29, %v3227_v48  ;;  %v1568_v26 = vpop.xlane.xlu0 %1567 }
 0x399   : > { %2379 = vrsqrt.f32 %v1568_v26 }
 0x39a   : > { %1618 = vst [vmem:[%s3273_s13 + $0x38] sm:$0xff] %v1602_v0 }
 0x39b   : > { %v2376_v5 = vpop.eup %2375 }
 0x39c   : > { %v1603_v35 = vmul.f32 %v2376_v5, %v3232_v24  ;;  %v1570_v12 = vpop.xlane.xlu1 %1569 }
 0x39d   : > { %2381 = vrsqrt.f32 %v1570_v12 }
 0x39e   : > { %1619 = vst [vmem:[%s3273_s13 + $0x40] sm:$0xff] %v1603_v35 }
 0x39f   : > { %v2378_v49 = vpop.eup %2377 }
 0x3a0   : > { %v1604_v15 = vmul.f32 %v2378_v49, %v3237_v47  ;;  %v1572_v13 = vpop.xlane.xlu0 %1571 }
 0x3a1   : > { %2383 = vrsqrt.f32 %v1572_v13 }
 0x3a2   : > { %1620 = vst [vmem:[%s3273_s13 + $0x48] sm:$0xff] %v1604_v15 }
 0x3a3   : > { %v2380_v30 = vpop.eup %2379 }
 0x3a4   : > { %v1605_v48 = vmul.f32 %v2380_v30, %v3242_v10  ;;  %v1574_v46 = vpop.xlane.xlu1 %1573 }
 0x3a5   : > { %2385 = vrsqrt.f32 %v1574_v46 }
 0x3a6   : > { %1621 = vst [vmem:[%s3273_s13 + $0x50] sm:$0xff] %v1605_v48 }
 0x3a7   : > { %v2382_v24 = vpop.eup %2381 }
 0x3a8   : > { %v1606_v27 = vmul.f32 %v2382_v24, %v3247_v56  ;;  %v1576_v51 = vpop.xlane.xlu0 %1575 }
 0x3a9   : > { %2387 = vrsqrt.f32 %v1576_v51 }
 0x3aa   : > { %1622 = vst [vmem:[%s3273_s13 + $0x58] sm:$0xff] %v1606_v27 }
 0x3ab   : > { %v2384_v47 = vpop.eup %2383 }
 0x3ac   : > { %v1607_v7 = vmul.f32 %v2384_v47, %v3252_v3  ;;  %v1578_v20 = vpop.xlane.xlu1 %1577 }
 0x3ad   : > { %2389 = vrsqrt.f32 %v1578_v20 }
 0x3ae   : > { %1623 = vst [vmem:[%s3273_s13 + $0x60] sm:$0xff] %v1607_v7 }
 0x3af   : > { %v2386_v10 = vpop.eup %2385 }
 0x3b0   : > { %v1608_v62 = vmul.f32 %v2386_v10, %v3257_v31 }
 0x3b2   : > { %1624 = vst [vmem:[%s3273_s13 + $0x68] sm:$0xff] %v1608_v62 }
 0x3b3   : > { %v2388_v57 = vpop.eup %2387 }
 0x3b4   : > { %v1609_v56 = vmul.f32 %v2388_v57, %v3262_v32 }
 0x3b6   : > { %1625 = vst [vmem:[%s3273_s13 + $0x70] sm:$0xff] %v1609_v56 }
 0x3b7   : > { %v2390_v50 = vpop.eup %2389 }
 0x3b8   : > { %v1610_v3 = vmul.f32 %v2390_v50, %v3267_v2 }
 0x3ba   : > { %1626 = vst [vmem:[%s3273_s13 + $0x78] sm:$0xff] %v1610_v3 }
 0x3bb   : > { %2490 = shalt.err (!%p2487_p2)
}
 0x3bc   : > { %s2491_s24 = scalar_lea.hbm %s3309_s14, 2048  ;;  %s2495_s28 = scalar_lea.hbm %s3362_s5, 4096 }
 0x3bd   : > { %p2492_p13 = scmp.ne.s32.totalorder %s3309_s14, %s2491_s24  ;;  %p2496_p4 = scmp.lt.u32.totalorder %s3309_s14, %s3362_s5 }
 0x3be   : > { %p2497_p7 = scmp.lt.u32.totalorder %s2495_s28, %s2491_s24  ;;  %p2499_p11 = scmp.lt.u32.totalorder %s2491_s24, %s3309_s14 }
 0x3bf   : > { %p2493_p6 = pnand %p2492_p13, %p3376_p0 }
 0x3c0   : > { %p2498_p8 = por %p2497_p7, %p2496_p4 }
 0x3c1   : > { %p2494_p10 = pneg %p2493_p6 }
 0x3c2   : > { %p2500_p1 = por %p2499_p11, %p2498_p8 }
 0x3c4   : > { %p2501_p3 = pnand %p2500_p1, %p2494_p10 }
 0x3c6   : > { %2504 = shalt.err (!%p2501_p3)
}
 0x3c7   : > { %s2559_s29 = smov 128   ;;  %s2560_s9 = smov 8  }
 0x3c8   : > { %2294 = dma.vmem_to_hbm [thread:$0]  (%p3376_p0), %s3311_s8, 2048, %s3309_s14, %s1628_s15, %s2559_s29, %s2559_s29, %s2560_s9  }
 0x3c9 PF: > { %s1656_s11 = sand.u32 1, %s2535_s18   ;;  %p3377_p5 = scmp.ne.s32.totalorder %s3367_s25, 0 }
 0x3ca   : > { %p3378_p9 = scmp.ge.s32.totalorder %s2547_s21, 2  ;;  %s1657_s23 = scalar_lea.sflag [#allocation4], %s1656_s11 }
 0x3cc   : > { %p2308_p12 = pnand %p3378_p9, %p3377_p5 }
 0x3ce   : > { %2530 = dma.done.wait (!%p2308_p12), %s1657_s23, 2048  }
 0x3cf   : > { %2532 = vsyncadd (!%p2308_p12), %s1657_s23, 4294965248  ;;  %p19_p2 = scmp.ge.s32.totalorder %s2701_s16, 4   ;;  %s3379_s18 = smov %s2539_s19 }
 0x3d0   : > { %s3380_s19 = smov %s2543_s20  ;;  %s3381_s20 = smov %s2710_s27 }
 0x3d1   : > { %s3382_s21 = smov %s2701_s16  ;;  %21 = sbr.rel (!%p19_p2) target bundleno = 6 (0x6), region = 93 }
 0x3d8   :  { %1662 = vsyncpa [#allocation3], 1 }
 0x3d9   :  { %1664 = vsyncpa [#allocation3 + $0x1], 1 }
 0x3da   :  { %1665 = vsyncpa [#allocation6], 1 }
 0x3db   :  { %1666 = vsyncpa [#allocation4], 1 }
 0x3dc   :  { %1668 = vsyncpa [#allocation4 + $0x1], 1 }

</bundles_post_ra>
